<compile_context>
chip_gen: v6e
topology: v6e:2x2x1
jax: 0.10.0
libtpu: 0.0.40
codegen_flags: <defaults>
</compile_context>

<pallas_src>
import functools

import jax
import jax.numpy as jnp
import numpy as np
from jax.experimental import pallas as pl
from jax.experimental.pallas import tpu as pltpu


def _round_up(x, m):
    return (x + m - 1) // m * m


def _vmem_capacity_bytes(default=128 * 1024 * 1024):
    """Physical VMEM of the current TPU generation (fallback: 128 MiB)."""
    try:
        info = pltpu.get_tpu_info()
        for name in ("vmem_capacity_bytes", "vmem_bytes", "vmem_capacity"):
            v = getattr(info, name, None)
            if isinstance(v, (int, np.integer)) and int(v) > 0:
                return int(v)
    except Exception:
        pass
    return default


def _estimate_step_vmem(th, W, C, Cout, L, in_bytes, out_bytes):
    """Rough per-grid-step VMEM bytes (last-dim-64 buffers budgeted at 128 lanes)."""
    lane = 128
    wp = _round_up(W + 2, 8)
    rows = th + 2 * L
    c_pad = _round_up(C, lane)
    cout_pad = _round_up(Cout, lane)
    k_pad = _round_up(3 * C, lane)
    # double-buffered pipeline blocks: input tile, halo sidecar, lane-dense output
    pipeline = 2 * (th * W * c_pad * in_bytes
                    + 2 * L * W * c_pad * in_bytes
                    + th * _round_up(W * Cout, lane) * out_bytes)
    weights = 2 * L * 3 * (3 * C) * cout_pad * 2          # bf16, resident
    # live in-kernel values: padded tile + a shifted copy (bf16), patches (bf16), acc (f32)
    live = rows * wp * (2 * c_pad * 2 + k_pad * 2) + rows * wp * cout_pad * 4
    return pipeline + weights + live


def _pick_tile_h(H, W, C, Cout, L, in_bytes, out_bytes, budget, n_batch):
    cands = [c for c in (256, 128, 64, 32, 16, 8) if c <= H and H % c == 0 and c >= L]
    if not cands:
        return H                       # H too small / not 8-aligned: one full-height tile
    th = None
    for c in cands:                    # largest tile that fits the VMEM budget
        if _estimate_step_vmem(c, W, C, Cout, L, in_bytes, out_bytes) <= budget:
            th = c
            break
    if th is None:
        th = cands[-1]
    # keep enough grid steps alive for 2 TensorCores / the double-buffered pipeline
    while (n_batch * (H // th) < 4 and th >= 16 and (th // 2) % 8 == 0
           and H % (th // 2) == 0 and (th // 2) >= L):
        th //= 2
    return th


def _conv_relu_stack_kernel(x_ref, halo_ref, w_ref, o_ref, *,
                            img_h, img_w, num_layers, tile_h, wp):
    # x_ref:    (1, TH, W, C)           row-tile of the (unpadded) layer-0 input
    # halo_ref: (1, 2L, W, C)           L rows above + L rows below the tile (zeros at borders)
    # w_ref:    (L, 3, 3*C, Cout) bf16  per-layer kw-fused weights (one (3C, Cout) mat per kh)
    # o_ref:    (1, TH, W*Cout)         lane-dense output tile of the LAST layer
    L = num_layers
    bf16 = jnp.bfloat16
    c_in = x_ref.shape[3]
    cout = w_ref.shape[3]
    rows0 = tile_h + 2 * L

    # ---- assemble the zero-padded layer-0 tile in bf16 (only pad COLUMNS are zero-filled,
    # ---- no full-tile zero pass; vertical image-border padding comes in as zero halo rows)
    x0 = x_ref[0].astype(bf16)                        # (TH, W, C)
    top = halo_ref[0, :L].astype(bf16)                # (L, W, C)
    bot = halo_ref[0, L:].astype(bf16)                # (L, W, C)
    body = jnp.concatenate([top, x0, bot], axis=0)    # (rows0, W, C)
    zl = jnp.zeros((rows0, 1, c_in), bf16)
    zr = jnp.zeros((rows0, wp - img_w - 1, c_in), bf16)
    cur = jnp.concatenate([zl, body, zr], axis=1)     # (rows0, WP, C)  padding=1 columns = 0

    base = pl.program_id(1) * tile_h                  # first output image-row of this tile

    for li in range(L):
        r_in = rows0 - 2 * li
        r_out = r_in - 2
        c_cur = cur.shape[2]
        nflat = r_in * wp

        # kw-fused im2col over the full padded width: flat row f=(r, j) of `patches` is
        # [x(j-1) | x(j) | x(j+1)] in bf16.  The flat +-1 shifts only leak into columns
        # that are dropped / re-zeroed below, so the kept columns are exact.
        # (pltpu.roll(xs, +-1, 0) is the XLU alternative; concatenate is kept here for
        #  robust lowering of packed-bf16 sublane shifts.)
        xs = cur.reshape(nflat, c_cur)
        zrow = jnp.zeros((1, c_cur), bf16)
        left = jnp.concatenate([zrow, xs[:nflat - 1]], axis=0)    # value at column j-1
        right = jnp.concatenate([xs[1:], zrow], axis=0)           # value at column j+1
        patches = jnp.concatenate([left, xs, right], axis=1)      # (nflat, 3C) bf16

        # 3 MXU matmuls (one per kh): K = 3*C, bf16 operands, f32 accumulation.
        acc = jnp.zeros((r_out * wp, cout), jnp.float32)
        for kh in range(3):
            acc = acc + jnp.dot(patches[kh * wp:(kh + r_out) * wp],
                                w_ref[li, kh],
                                preferred_element_type=jnp.float32)

        if li == L - 1:
            # ReLU in f32, cast to the output dtype BEFORE the halo-column slice /
            # lane-dense reshape so the relayout copy moves half the bytes.
            out = jnp.maximum(acc, 0.0).astype(o_ref.dtype).reshape(tile_h, wp, cout)
            o_ref[0] = out[:, 1:img_w + 1, :].reshape(tile_h, img_w * cout)
        else:
            # Intermediate activation stays bf16 & resident in VMEM (never hits HBM).
            # Re-apply padding=1 zeros (column 0 / columns > W, image-border rows) so the
            # next fused layer sees a correctly padded tile.
            out = jnp.maximum(acc, 0.0).astype(bf16).reshape(r_out, wp, cout)
            pad = L - li - 1
            col = jax.lax.broadcasted_iota(jnp.int32, (r_out, wp, 1), 1)
            row = base - pad + jax.lax.broadcasted_iota(jnp.int32, (r_out, wp, 1), 0)
            keep = (col >= 1) & (col <= img_w) & (row >= 0) & (row < img_h)
            cur = jnp.where(keep, out, jnp.zeros_like(out))


def conv_relu_stack_nhwc(x_nhwc, w_fused, *, th=None, out_dtype=None, vmem_limit_bytes=None):
    """L fused Conv_ReLU_Blocks on NHWC activations in a single pallas_call.

    x_nhwc:  (N, H, W, C) float32 or bfloat16
    w_fused: (L, 3, 3*C, Cout) kw-fused weights (cast to bf16); Cout == C required if L > 1.
    Returns (N, H, W, Cout) in `out_dtype` (default: x dtype; pass jnp.bfloat16 when
    chaining several pallas_calls to halve HBM traffic).
    """
    N, H, W, C = x_nhwc.shape
    L, k3, kc, Cout = w_fused.shape
    assert k3 == 3 and kc == 3 * C, "w_fused must be (L, 3, 3*C, Cout)"
    assert L == 1 or Cout == C, "fused layers require Cout == Cin"
    w_fused = w_fused.astype(jnp.bfloat16)

    out_dtype = np.dtype(out_dtype) if out_dtype is not None else np.dtype(x_nhwc.dtype)
    in_bytes = np.dtype(x_nhwc.dtype).itemsize
    out_bytes = out_dtype.itemsize

    phys = _vmem_capacity_bytes()
    if vmem_limit_bytes is None:
        # ~96 MiB on 128-MiB chips (v5e / v6e), ~32 MiB scoped on 64-MiB v7x.
        vmem_limit_bytes = min(96 * 1024 * 1024, max(32 * 1024 * 1024, phys - 32 * 1024 * 1024))
    budget = int(0.85 * vmem_limit_bytes)

    if th is None:
        th = _pick_tile_h(H, W, C, Cout, L, in_bytes, out_bytes, budget, N)
    if H % th != 0:
        th = H
    assert th == H or th % 8 == 0, "row tile must be a multiple of 8 (or the full height)"
    assert th >= L, "row tile must be at least the fusion depth"
    nh = H // th
    wp = _round_up(W + 2, 8)

    # Halo sidecar: L rows above + L rows below each tile (zero rows at the image border).
    # Costs ~2L/TH of the input instead of a full spatially-padded copy in HBM.
    zrows = jnp.zeros((N, 1, L, W, C), x_nhwc.dtype)
    if nh > 1:
        x_tiles = x_nhwc.reshape(N, nh, th, W, C)
        tops = jnp.concatenate([zrows, x_tiles[:, :-1, th - L:]], axis=1)   # (N, nh, L, W, C)
        bots = jnp.concatenate([x_tiles[:, 1:, :L], zrows], axis=1)
    else:
        tops, bots = zrows, zrows
    halo = jnp.concatenate([tops, bots], axis=2).reshape(N, nh * 2 * L, W, C)

    kernel = functools.partial(_conv_relu_stack_kernel,
                               img_h=H, img_w=W, num_layers=L, tile_h=th, wp=wp)

    out_flat = pl.pallas_call(
        kernel,
        out_shape=jax.ShapeDtypeStruct((N, H, W * Cout), out_dtype),
        grid=(N, nh),
        in_specs=[
            pl.BlockSpec((1, th, W, C), lambda n, t: (n, t, 0, 0)),
            pl.BlockSpec((1, 2 * L, W, C), lambda n, t: (n, t, 0, 0)),
            pl.BlockSpec((L, 3, 3 * C, Cout), lambda n, t: (0, 0, 0, 0)),  # weights resident
        ],
        out_specs=pl.BlockSpec((1, th, W * Cout), lambda n, t: (n, t, 0)),
        compiler_params=pltpu.CompilerParams(
            dimension_semantics=("parallel", "parallel"),
            vmem_limit_bytes=int(vmem_limit_bytes),
        ),
    )(x_nhwc, halo, w_fused)
    return out_flat.reshape(N, H, W, Cout)


def fuse_weights(w_oihw_list):
    """[(Cout, Cin, 3, 3), ...] -> (L, 3, 3*Cin, Cout) bf16 (kw folded into the contraction)."""
    ws = []
    for w in w_oihw_list:
        Cout, Cin, KH, KW = w.shape
        assert (KH, KW) == (3, 3)
        ws.append(jnp.transpose(w, (2, 3, 1, 0)).reshape(3, 3 * Cin, Cout))
    return jnp.stack(ws, axis=0).astype(jnp.bfloat16)


def conv_relu_block(x_nchw, w_oihw, *, th=None, out_dtype=None):
    """PyTorch-convention forward of a single Conv_ReLU_Block. x: (N,C,H,W), w: (Cout,Cin,3,3)."""
    N, C, H, W = x_nchw.shape
    Cout, Cin, KH, KW = w_oihw.shape
    assert (KH, KW) == (3, 3) and Cin == C
    x_nhwc = jnp.transpose(x_nchw, (0, 2, 3, 1))
    out_nhwc = conv_relu_stack_nhwc(x_nhwc, fuse_weights([w_oihw]), th=th, out_dtype=out_dtype)
    return jnp.transpose(out_nhwc, (0, 3, 1, 2))


def conv_relu_stack(x_nchw, w_oihw_list, *, th=None, out_dtype=None):
    """L consecutive Conv_ReLU_Blocks fused into one pallas_call (PyTorch NCHW convention)."""
    x_nhwc = jnp.transpose(x_nchw, (0, 2, 3, 1))
    out_nhwc = conv_relu_stack_nhwc(x_nhwc, fuse_weights(list(w_oihw_list)),
                                    th=th, out_dtype=out_dtype)
    return jnp.transpose(out_nhwc, (0, 3, 1, 2))


if __name__ == "__main__":
    key = jax.random.PRNGKey(0)
    kx, k1, k2, k3 = jax.random.split(key, 4)

    N, Cn, H, W = 2, 64, 16, 16  # module default channel count, small spatial size
    scale = 1.0 / (3.0 * Cn) ** 0.5
    x = jax.random.normal(kx, (N, Cn, H, W), dtype=jnp.float32)
    w1 = jax.random.normal(k1, (Cn, Cn, 3, 3), dtype=jnp.float32) * scale
    w2 = jax.random.normal(k2, (Cn, Cn, 3, 3), dtype=jnp.float32) * scale
    w3 = jax.random.normal(k3, (Cn, Cn, 3, 3), dtype=jnp.float32) * scale

    def ref_block(xv, wv):
        # Reference with the same bf16-operand / f32-accumulate numerics, + ReLU (f32 out).
        y = jax.lax.conv_general_dilated(
            xv.astype(jnp.bfloat16), wv.astype(jnp.bfloat16),
            window_strides=(1, 1), padding="SAME",
            dimension_numbers=("NCHW", "OIHW", "NCHW"),
            preferred_element_type=jnp.float32)
        return jnp.maximum(y, 0.0)

    # 1) Single Conv_ReLU_Block (the module): tiled (th=8 exercises the halo path) and
    #    whole-image (th=16, single grid step per batch element).
    out_tiled = jax.block_until_ready(conv_relu_block(x, w1, th=8))
    out_whole = jax.block_until_ready(conv_relu_block(x, w1, th=16))
    ref1 = ref_block(x, w1)
    assert out_tiled.shape == ref1.shape == (N, Cn, H, W)
    assert jnp.allclose(out_tiled, ref1, atol=2e-2, rtol=2e-2), "mismatch (row-tiled)"
    assert jnp.allclose(out_whole, ref1, atol=2e-2, rtol=2e-2), "mismatch (single tile)"

    # 2) bf16 activation output (halves HBM writeback when chaining blocks).
    out_bf16 = jax.block_until_ready(conv_relu_block(x, w1, out_dtype=jnp.bfloat16))
    assert out_bf16.dtype == jnp.bfloat16
    assert jnp.allclose(out_bf16.astype(jnp.float32), ref1, atol=3e-2, rtol=3e-2), "mismatch (bf16 out)"

    # 3) Three Conv_ReLU_Blocks fused into ONE pallas_call (intermediates stay bf16 in VMEM).
    out_fused = jax.block_until_ready(conv_relu_stack(x, [w1, w2, w3]))
    r = ref1.astype(jnp.bfloat16)               # bf16 inter-layer activations, like the kernel
    r = ref_block(r, w2).astype(jnp.bfloat16)
    ref3 = ref_block(r, w3)
    assert out_fused.shape == (N, Cn, H, W)
    assert jnp.allclose(out_fused, ref3, atol=5e-2, rtol=5e-2), "mismatch (3-block fusion)"

    print("KERNEL_OK")
</pallas_src>

<mosaic_0001>
module attributes {stable_mosaic.version = 11 : i64} {
  func.func @_conv_relu_stack_kernel(%arg0: i32, %arg1: i32, %arg2: memref<1x8x16x64xf32, #tpu.memory_space<vmem>>, %arg3: memref<1x2x16x64xf32, #tpu.memory_space<vmem>>, %arg4: memref<1x3x192x64xbf16, #tpu.memory_space<vmem>>, %arg5: memref<1x8x1024xf32, #tpu.memory_space<vmem>>) attributes {dimension_semantics = [#tpu.dimension_semantics<parallel>, #tpu.dimension_semantics<parallel>], iteration_bounds = array<i64: 2, 2>, scalar_prefetch = 0 : i64, scratch_operands = 0 : i64, tpu.core_type = #tpu.core_type<tc>, window_params = [{transform_indices = @transform_0, window_bounds = array<i64: 1, 8, 16, 64>}, {transform_indices = @transform_1, window_bounds = array<i64: 1, 2, 16, 64>}, {pipeline_mode = #tpu.pipeline_mode<synchronous>, transform_indices = @transform_2, window_bounds = array<i64: 1, 3, 192, 64>}, {transform_indices = @transform_3, window_bounds = array<i64: 1, 8, 1024>}]} {
    %c0 = arith.constant 0 : index
    %c0_0 = arith.constant 0 : index
    %c0_1 = arith.constant 0 : index
    %c0_2 = arith.constant 0 : index
    %0 = vector.load %arg2[%c0, %c0_0, %c0_1, %c0_2] : memref<1x8x16x64xf32, #tpu.memory_space<vmem>>, vector<1x8x16x64xf32>
    %1 = vector.shape_cast %0 : vector<1x8x16x64xf32> to vector<8x16x64xf32>
    %2 = arith.truncf %1 : vector<8x16x64xf32> to vector<8x16x64xbf16>
    %c0_3 = arith.constant 0 : index
    %c0_4 = arith.constant 0 : index
    %c0_5 = arith.constant 0 : index
    %c0_6 = arith.constant 0 : index
    %3 = vector.load %arg3[%c0_3, %c0_4, %c0_5, %c0_6] : memref<1x2x16x64xf32, #tpu.memory_space<vmem>>, vector<1x1x16x64xf32>
    %4 = vector.shape_cast %3 : vector<1x1x16x64xf32> to vector<1x16x64xf32>
    %5 = arith.truncf %4 : vector<1x16x64xf32> to vector<1x16x64xbf16>
    %c0_7 = arith.constant 0 : index
    %c1 = arith.constant 1 : index
    %c0_8 = arith.constant 0 : index
    %c0_9 = arith.constant 0 : index
    %6 = vector.load %arg3[%c0_7, %c1, %c0_8, %c0_9] : memref<1x2x16x64xf32, #tpu.memory_space<vmem>>, vector<1x1x16x64xf32>
    %7 = vector.shape_cast %6 : vector<1x1x16x64xf32> to vector<1x16x64xf32>
    %8 = arith.truncf %7 : vector<1x16x64xf32> to vector<1x16x64xbf16>
    %9 = tpu.concatenate %5, %2, %8 in 0 : vector<1x16x64xbf16>, vector<8x16x64xbf16>, vector<1x16x64xbf16> -> vector<10x16x64xbf16>
    %cst = arith.constant 0.000000e+00 : bf16
    %10 = vector.broadcast %cst : bf16 to vector<10x1x64xbf16>
    %cst_10 = arith.constant 0.000000e+00 : bf16
    %11 = vector.broadcast %cst_10 : bf16 to vector<10x7x64xbf16>
    %12 = tpu.concatenate %10, %9, %11 in 1 : vector<10x1x64xbf16>, vector<10x16x64xbf16>, vector<10x7x64xbf16> -> vector<10x24x64xbf16>
    %13 = vector.shape_cast %12 : vector<10x24x64xbf16> to vector<240x64xbf16>
    %cst_11 = arith.constant 0.000000e+00 : bf16
    %14 = vector.broadcast %cst_11 : bf16 to vector<1x64xbf16>
    %15 = vector.extract_strided_slice %13 {offsets = [0, 0], sizes = [239, 64], strides = [1, 1]} : vector<240x64xbf16> to vector<239x64xbf16>
    %16 = tpu.concatenate %14, %15 in 0 : vector<1x64xbf16>, vector<239x64xbf16> -> vector<240x64xbf16>
    %17 = vector.extract_strided_slice %13 {offsets = [1, 0], sizes = [239, 64], strides = [1, 1]} : vector<240x64xbf16> to vector<239x64xbf16>
    %18 = tpu.concatenate %17, %14 in 0 : vector<239x64xbf16>, vector<1x64xbf16> -> vector<240x64xbf16>
    %19 = tpu.concatenate %16, %13, %18 in 1 : vector<240x64xbf16>, vector<240x64xbf16>, vector<240x64xbf16> -> vector<240x192xbf16>
    %cst_12 = arith.constant 0.000000e+00 : f32
    %20 = vector.broadcast %cst_12 : f32 to vector<192x64xf32>
    %21 = vector.extract_strided_slice %19 {offsets = [0, 0], sizes = [192, 192], strides = [1, 1]} : vector<240x192xbf16> to vector<192x192xbf16>
    %c0_13 = arith.constant 0 : index
    %c0_14 = arith.constant 0 : index
    %c0_15 = arith.constant 0 : index
    %c0_16 = arith.constant 0 : index
    %22 = vector.load %arg4[%c0_13, %c0_14, %c0_15, %c0_16] : memref<1x3x192x64xbf16, #tpu.memory_space<vmem>>, vector<1x1x192x64xbf16>
    %23 = vector.shape_cast %22 : vector<1x1x192x64xbf16> to vector<192x64xbf16>
    %cst_17 = arith.constant dense<0.000000e+00> : vector<192x64xf32>
    %24 = tpu.matmul %21, %23, %cst_17 {dimension_numbers = #tpu.dot_dimension_numbers<[1], [0], [0], [1], [0, 0, 1, 1], [], []>} : vector<192x192xbf16>, vector<192x64xbf16>, vector<192x64xf32> -> vector<192x64xf32>
    %25 = arith.addf %20, %24 : vector<192x64xf32>
    %26 = vector.extract_strided_slice %19 {offsets = [24, 0], sizes = [192, 192], strides = [1, 1]} : vector<240x192xbf16> to vector<192x192xbf16>
    %c0_18 = arith.constant 0 : index
    %c1_19 = arith.constant 1 : index
    %c0_20 = arith.constant 0 : index
    %c0_21 = arith.constant 0 : index
    %27 = vector.load %arg4[%c0_18, %c1_19, %c0_20, %c0_21] : memref<1x3x192x64xbf16, #tpu.memory_space<vmem>>, vector<1x1x192x64xbf16>
    %28 = vector.shape_cast %27 : vector<1x1x192x64xbf16> to vector<192x64xbf16>
    %cst_22 = arith.constant dense<0.000000e+00> : vector<192x64xf32>
    %29 = tpu.matmul %26, %28, %cst_22 {dimension_numbers = #tpu.dot_dimension_numbers<[1], [0], [0], [1], [0, 0, 1, 1], [], []>} : vector<192x192xbf16>, vector<192x64xbf16>, vector<192x64xf32> -> vector<192x64xf32>
    %30 = arith.addf %25, %29 : vector<192x64xf32>
    %31 = vector.extract_strided_slice %19 {offsets = [48, 0], sizes = [192, 192], strides = [1, 1]} : vector<240x192xbf16> to vector<192x192xbf16>
    %c0_23 = arith.constant 0 : index
    %c2 = arith.constant 2 : index
    %c0_24 = arith.constant 0 : index
    %c0_25 = arith.constant 0 : index
    %32 = vector.load %arg4[%c0_23, %c2, %c0_24, %c0_25] : memref<1x3x192x64xbf16, #tpu.memory_space<vmem>>, vector<1x1x192x64xbf16>
    %33 = vector.shape_cast %32 : vector<1x1x192x64xbf16> to vector<192x64xbf16>
    %cst_26 = arith.constant dense<0.000000e+00> : vector<192x64xf32>
    %34 = tpu.matmul %31, %33, %cst_26 {dimension_numbers = #tpu.dot_dimension_numbers<[1], [0], [0], [1], [0, 0, 1, 1], [], []>} : vector<192x192xbf16>, vector<192x64xbf16>, vector<192x64xf32> -> vector<192x64xf32>
    %35 = arith.addf %30, %34 : vector<192x64xf32>
    %cst_27 = arith.constant 0.000000e+00 : f32
    %36 = vector.broadcast %cst_27 : f32 to vector<192x64xf32>
    %37 = arith.maximumf %35, %36 : vector<192x64xf32>
    %38 = vector.shape_cast %37 : vector<192x64xf32> to vector<8x24x64xf32>
    %39 = vector.extract_strided_slice %38 {offsets = [0, 1, 0], sizes = [8, 16, 64], strides = [1, 1, 1]} : vector<8x24x64xf32> to vector<8x16x64xf32>
    %40 = vector.shape_cast %39 : vector<8x16x64xf32> to vector<8x1024xf32>
    %c0_28 = arith.constant 0 : index
    %c0_29 = arith.constant 0 : index
    %c0_30 = arith.constant 0 : index
    %41 = vector.load %arg5[%c0_28, %c0_29, %c0_30] : memref<1x8x1024xf32, #tpu.memory_space<vmem>>, vector<1x8x1024xf32>
    %42 = vector.shape_cast %41 : vector<1x8x1024xf32> to vector<8x1024xf32>
    %43 = vector.shape_cast %40 : vector<8x1024xf32> to vector<1x8x1024xf32>
    tpu.vector_store %arg5[%c0_28, %c0_29, %c0_30], %43 {strides = array<i32>} : memref<1x8x1024xf32, #tpu.memory_space<vmem>>, vector<1x8x1024xf32>,
    return
  }
  func.func @transform_0(%arg0: i32, %arg1: i32) -> (i32, i32, i32, i32) {
    %c0_i32 = arith.constant 0 : i32
    %c0_i32_0 = arith.constant 0 : i32
    %c0_i32_1 = arith.constant 0 : i32
    return %arg0, %arg1, %c0_i32, %c0_i32_0 : i32, i32, i32, i32
  }
  func.func @transform_1(%arg0: i32, %arg1: i32) -> (i32, i32, i32, i32) {
    %c0_i32 = arith.constant 0 : i32
    %c0_i32_0 = arith.constant 0 : i32
    %c0_i32_1 = arith.constant 0 : i32
    return %arg0, %arg1, %c0_i32, %c0_i32_0 : i32, i32, i32, i32
  }
  func.func @transform_2(%arg0: i32, %arg1: i32) -> (i32, i32, i32, i32) {
    %c0_i32 = arith.constant 0 : i32
    %c0_i32_0 = arith.constant 0 : i32
    %c0_i32_1 = arith.constant 0 : i32
    %c0_i32_2 = arith.constant 0 : i32
    %c0_i32_3 = arith.constant 0 : i32
    return %c0_i32, %c0_i32_0, %c0_i32_1, %c0_i32_2 : i32, i32, i32, i32
  }
  func.func @transform_3(%arg0: i32, %arg1: i32) -> (i32, i32, i32) {
    %c0_i32 = arith.constant 0 : i32
    %c0_i32_0 = arith.constant 0 : i32
    return %arg0, %arg1, %c0_i32 : i32, i32, i32
  }
}

</mosaic_0001>

<bundles_post_ra>
// kernel: tpu_custom_call.1
= control target key start
LH: loop header
LB: loop body
LE: loop exit
PB: predicated region body
PF: predicated region fallthrough
CT: control target
= control target key end

     0   :  { %8 = vsyncpa [#allocation3], 0  ;;  %s3780_s0 = inlined_call_operand.hbm [shape: f32[2,16,16,64], index: 0, kind: input, shape index: {}]   ;;  %s3781_s1 = inlined_call_operand.vmem [shape: f32[2,4,16,64], index: 1, kind: input, shape index: {}]   ;;  %s3782_s2 = inlined_call_operand.vmem [shape: bf16[1,3,192,64], index: 2, kind: input, shape index: {}]   ;;  %s3783_s3 = inlined_call_operand.hbm [shape: f32[2,16,1024], index: 3, kind: output, shape index: {}]  }
   0x1   :  { %10 = vsyncpa [#allocation3 + $0x1], 0 }
   0x2   :  { %11 = vsyncpa [#allocation4], 0 }
   0x3   :  { %13 = vsyncpa [#allocation4 + $0x1], 0  ;;  %s2575_s12 = smov 0   ;;  %s2577_s13 = smov 0  }
   0x4   :  { %s2579_s14 = smov 0   ;;  %s2581_s15 = smov 0  }
   0x5   :  { %s2583_s16 = smov 0   ;;  %s2585_s17 = smov 0  }
   0x6   :  { %s2587_s18 = smov 0   ;;  %s2589_s19 = smov 0  }
   0x7 LB: > { %s2127_s20 = sadd.s32 4294967295, %s2545_s19   ;;  %s2128_s21 = sadd.s32 4294967294, %s2545_s19   ;;  %s2545_s19 = sphi %s2589_s19, %s19_s19   ;;  %s2541_s18 = sphi %s2587_s18, %s3807_s18   ;;  %s2537_s17 = sphi %s2585_s17, %s3806_s17   ;;  %s2533_s16 = sphi %s2583_s16, %s3805_s16   ;;  %s2529_s15 = sphi %s2581_s15, %s3804_s15   ;;  %s2525_s14 = sphi %s2579_s14, %s3803_s14   ;;  %s2521_s13 = sphi %s2577_s13, %s3802_s13   ;;  %s2517_s12 = sphi %s2575_s12, %s3801_s12  }
   0x8   : > { %s28_s22 = sadd.s32 1, %s2537_s17  ;;  %s31_s23 = sadd.s32 1, %s2541_s18 }
   0x9   : > { %p29_p0 = scmp.ge.s32.totalorder %s28_s22, 2  ;;  %s40_s24 = sadd.s32 1, %s2525_s14 }
   0xa   : > { %p47_p1 = scmp.ne.s32.totalorder %s2525_s14, %s2521_s13  ;;  %p48_p2 = scmp.eq.s32.totalorder %s2545_s19, 0 }
   0xb   : > { %s3809_s22 = smov (%p29_p0, %s28_s22), 0  ;;  %s3811_s23 = smov (!%p29_p0, %s31_s23), %s2541_s18 }
   0xc   : > { %3788 = sst [smem:[#allocation8_spill]] %s3809_s22  ;;  %s36_s25 = ssub.s32 %s2537_s17, %s3809_s22 }
   0xd   : > { %p2628_p3 = por %p48_p2, %p47_p1  ;;  %p33_p4 = scmp.ge.s32.totalorder %s3811_s23, 2 }
   0xe   : > { %p53_p5 = scmp.ne.s32.totalorder %s2521_s13, %s2517_s12  ;;  %p54_p6 = scmp.eq.s32.totalorder %s2127_s20, 0 }
   0xf   : > { %p128_p7 = scmp.eq.s32.totalorder %s2127_s20, 3  ;;  %s3813_s23 = smov (%p33_p4, %s3811_s23), 0 }
  0x10   : > { %3790 = sst [smem:[#allocation9_spill]] %s3813_s23  ;;  %p2636_p8 = por %p54_p6, %p53_p5 }
  0x11   : > { %p2640_p9 = por %p128_p7, %p47_p1  ;;  %s35_s29 = ssub.s32 %s2541_s18, %s3813_s23 }
  0x12   : > { %p134_p10 = scmp.eq.s32.totalorder %s2128_s21, 3  ;;  %s37_s30 = sor.u32 %s36_s25, %s35_s29 }
  0x13   : > { %p38_p11 = scmp.eq.s32.totalorder %s37_s30, 0  ;;  %p2313_p13 = scmp.lt.s32.totalorder %s2545_s19, 4 }
  0x14   : > { %p2646_p12 = por %p134_p10, %p53_p5  ;;  %s157_s5 = sand.u32 1, %s2525_s14  }
  0x15   : > { %s2653_s6 = scalar_select %p38_p11, %s2525_s14, %s40_s24  }
  0x16   : > { %s2131_s7 = sshll.u32 %s157_s5, 7  ;;  %s2276_s8 = sshll.u32 %s2537_s17, 4 }
  0x17   : > { %s2134_s9 = sshll.u32 %s2541_s18, 5  ;;  %s161_s10 = scalar_lea.vmem [#allocation2], %s2131_s7 }
  0x18   : > { %s171_s11 = sshll.u32 %s161_s10, 4  ;;  %s168_s20 = sadd.s32 %s2276_s8, %s2134_s9  ;;  %s172_s11 = int_to_ptr.vmem [resolvable:$true] %s171_s11 }
  0x19   : > { %s2135_s23 = sshll.u32 %s168_s20, 7  ;;  %p2659_p0 = pnand %p2313_p13, %p2628_p3 }
  0x1a   : > { %s170_s30 = scalar_lea.hbm %s3780_s0, %s2135_s23  ;;  %s158_s24 = scalar_lea.sflag [#allocation3], %s157_s5 }
  0x1b   : > { %p2423_p1 = pneg %p2659_p0  ;;  %s2434_s22 = scalar_lea.vmem %s172_s11, 2048 }
  0x1c   : > { %p2435_p2 = scmp.ne.s32.totalorder %s172_s11, %s2434_s22  ;;  %s2547_s7 = smov [#allocation2]  }
  0x1d   : > { %s2439_s8 = sshll.u32 %s2547_s7, 4  ;;  %s2440_s8 = int_to_ptr.vmem [resolvable:$false] %s2439_s8 }
  0x1e   : > { %p2437_p4 = pnand %p2435_p2, %p2423_p1  ;;  %s2441_s26 = scalar_lea.vmem %s2440_s8, 4096 }
  0x1f   : > { %p2442_p3 = scmp.lt.s32.totalorder %s172_s11, %s2440_s8  ;;  %p2443_p6 = scmp.lt.s32.totalorder %s2441_s26, %s2434_s22 }
  0x20   : > { %p2438_p5 = pneg %p2437_p4 }
  0x21   : > { %p2444_p7 = por %p2443_p6, %p2442_p3 }
  0x23   : > { %p2445_p10 = pnand %p2444_p7, %p2438_p5 }
  0x25   : > { %2448 = shalt.err (!%p2445_p10)
}
  0x26   : > { %s2548_s9 = smov 128   ;;  %s2549_s23 = smov 8  }
  0x27   : > { %2308 = dma.hbm_to_vmem [thread:$0]  (!%p2659_p0), %s170_s30, 2048, %s172_s11, %s158_s24, %s2548_s9, %s2548_s9, %s2549_s23  }
  0x28   : > { %p2136_p11 = scmp.ge.s32.totalorder %s2545_s19, 1  ;;  %p193_p13 = scmp.lt.s32.totalorder %s2545_s19, 5 }
  0x2a   : > { %p194_p1 = pnand %p2136_p11, %p193_p13 }
  0x2b   : > { %s2673_s5 = sand.u32 (!%p194_p1), 1, %s2521_s13  }
  0x2c   : > { %197 = sbr.rel (%p194_p1) target bundleno = 678 (0x2a6), region = 32  ;;  %s2137_s22 = sshll.u32 (!%p194_p1), %s2673_s5, 7 }
  0x2d   : > { %s200_s10 = scalar_lea.sflag (!%p194_p1), [#allocation3], %s2673_s5  ;;  %s2677_s20 = scalar_lea.vmem (!%p194_p1), [#allocation2], %s2137_s22 }
  0x31   : > { %2508 = dma.done.wait (%p2636_p8), %s200_s10, 2048  }
  0x32   : > { %2510 = vsyncadd (%p2636_p8), %s200_s10, 4294965248  ;;  %s2139_s11 = sshll.u32 %s2529_s15, 1  ;;  %p238_p0 = scmp.lt.s32.totalorder %s2533_s16, 1  ;;  %v2550_v0 = vmov 0   ;;  %v255_v1 = vld [vmem:[%s2677_s20 + $0x30] sm:$0xff]  ;;  %v256_v2 = vld [vmem:[%s2677_s20 + $0x38] sm:$0xff] }
  0x33   : > { %p240_p2 = scmp.lt.s32.totalorder %s2139_s11, 3  ;;  %2277 = vmatprep.subr.bf16.mxu1 %v2550_v0  ;;  %952 = vmatprep.subr.bf16.mxu0 %v2550_v0  ;;  %v257_v3 = vld [vmem:[%s2677_s20 + $0x40] sm:$0xff]  ;;  %vm370_vm0 = vcmask 1040384   ;;  %v258_v4 = vld [vmem:[%s2677_s20 + $0x48] sm:$0xff]  ;;  %v2692_v5 = vpack.c.bf16 %v256_v2, %v255_v1  ;;  %vm371_vm1 = vsmask.f32 256 }
  0x34   : > { %s239_s21 = scalar_select %p238_p0, %s2533_s16, 1  ;;  %v249_v6 = vld [vmem:[%s2677_s20] sm:$0xff]  ;;  %v250_v7 = vld [vmem:[%s2677_s20 + $0x8] sm:$0xff]  ;;  %v269_v8 = vpack.c.bf16 %v258_v4, %v257_v3  ;;  %v259_v10 = vld [vmem:[%s2677_s20 + $0x50] sm:$0xff]  ;;  %vm658_vm3 = vcmask 523264   ;;  %vm781_vm5 = vcmask 1043456  }
  0x35   : > { %s3815_s11 = smov (!%p240_p2, %s2139_s11), 3  ;;  %v265_v9 = vpack.c.bf16 %v250_v7, %v249_v6  ;;  %v260_v11 = vld [vmem:[%s2677_s20 + $0x58] sm:$0xff]  ;;  %v251_v12 = vld [vmem:[%s2677_s20 + $0x10] sm:$0xff]  ;;  %v309_v13 = vshrl.u32 %v2692_v5, 16  ;;  %vm2710_vm2 = vmand %vm370_vm0, %vm371_vm1  ;;  %s2551_s10 = smov 64   ;;  %v312_v7 = vshll.u32 %v2692_v5, 16 }
  0x36   : > { %s2141_s27 = sshll.u32 %s239_s21, 3  ;;  %s2140_s25 = sshll.u32 %s3815_s11, 1  ;;  %v270_v16 = vpack.c.bf16 %v260_v11, %v259_v10  ;;  %v252_v17 = vld [vmem:[%s2677_s20 + $0x18] sm:$0xff]  ;;  %v316_v18 = vshrl.u32 %v269_v8, 16  ;;  %v319_v19 = vshll.u32 %v269_v8, 16  ;;  %v261_v23 = vld [vmem:[%s2677_s20 + $0x60] sm:$0xff] }
  0x37   : > { %s244_s29 = sadd.s32 %s2141_s27, %s2140_s25  ;;  %v288_v22 = vshrl.u32 %v265_v9, 16  ;;  %v262_v24 = vld [vmem:[%s2677_s20 + $0x68] sm:$0xff]  ;;  %v2718_v25 = vrot.slane %v309_v13, 7  ;;  %v291_v26 = vshll.u32 %v265_v9, 16  ;;  %v266_v32 = vpack.c.bf16 %v252_v17, %v251_v12  ;;  %v2385_v40 = vld [vmem:[%s3782_s2 + $0x98] sm:$0xff]   ;;  %v2386_v49 = vld [vmem:[%s3782_s2 + $0x90] sm:$0xff]  }
  0x38   : > { %s2142_s30 = sshll.u32 %s244_s29, 3  ;;  %v323_v27 = vshrl.u32 %v270_v16, 16  ;;  %v326_v28 = vshll.u32 %v270_v16, 16  ;;  %v318_v29 = vrot.slane %v316_v18, 7  ;;  %v2726_v35 = vpack.c.bf16 %v262_v24, %v261_v23  ;;  %2289 = vmatpush1.bf16.msra.mxu1 %v2385_v40  ;;  %953 = vmatpush1.bf16.msra.mxu0 %v2385_v40  ;;  %v253_v54 = vld [vmem:[%s2677_s20 + $0x20] sm:$0xff]  ;;  %v254_v58 = vld [vmem:[%s2677_s20 + $0x28] sm:$0xff] }
  0x39   : > { %s2699_s8 = scalar_lea.vmem %s3781_s1, %s2142_s30  ;;  %v290_v31 = vrot.slane %v288_v22, 7  ;;  %v387_v33 = vsel %vm2710_vm2, %v2718_v25, 0  ;;  %v295_v44 = vshrl.u32 %v266_v32, 16  ;;  %2278 = vmatprep.subr.bf16.mxu1 %v2550_v0  ;;  %954 = vmatprep.subr.bf16.mxu0 %v2550_v0  ;;  %v298_v56 = vshll.u32 %v266_v32, 16  ;;  %v2387_v3 = vld [vmem:[%s3782_s2 + $0x88] sm:$0xff]   ;;  %v2388_v12 = vld [vmem:[%s3782_s2 + $0x80] sm:$0xff]  }
  0x3a   : > { %v273_v14 = vld [vmem:[%s2699_s8] sm:$0xff]  ;;  %v274_v15 = vld [vmem:[%s2699_s8 + $0x8] sm:$0xff]  ;;  %v2724_v34 = vrot.slane %v323_v27, 7  ;;  %v321_v36 = vor.u32 %v319_v19, %v318_v29  ;;  %v388_v39 = vsel %vm2710_vm2, %v318_v29, 0  ;;  %v330_v57 = vshrl.u32 %v2726_v35, 16  ;;  %v263_v27 = vld [vmem:[%s2677_s20 + $0x70] sm:$0xff] }
  0x3b   : > { %v2714_v21 = vpack.c.bf16 %v274_v15, %v273_v14  ;;  %v293_v38 = vor.u32 %v291_v26, %v290_v31  ;;  %v430_v41 = vunpack.c.l.b16 %v388_v39  ;;  %v384_v42 = vsel %vm2710_vm2, %v290_v31, 0  ;;  %v264_v32 = vld [vmem:[%s2677_s20 + $0x78] sm:$0xff]  ;;  %s2138_s23 = sshll.u32 %s2673_s5, 6  ;;  %s2271_s11 = sshll.u32 %s2529_s15, 3 }
  0x3c   : > { %v328_v43 = vor.u32 %v326_v28, %v2724_v34  ;;  %v378_v45 = vsel %vm2710_vm2, 0, %v321_v36  ;;  %v418_v48 = vunpack.c.l.b16 %v384_v42  ;;  %v2755_v55 = vrot.slane %v295_v44, 7  ;;  %2290 = vmatpush1.bf16.msra.mxu1 %v2386_v49  ;;  %955 = vmatpush1.bf16.msra.mxu0 %v2386_v49  ;;  %v2143_v42 = vld [vmem:[%s2699_s8 + $0x10] sm:$0xff]  ;;  %s235_s22 = scalar_lea.vmem [#allocation5], %s2138_s23  ;;  %s2272_s21 = sshll.u32 %s2533_s16, 4 }
  0x3d   : > { %v281_v30 = vshrl.u32 %v2714_v21, 16  ;;  %v374_v46 = vsel %vm2710_vm2, 0, %v293_v38  ;;  %v2748_v50 = vcombine.low %v387_v33, %v378_v45  ;;  %v429_v52 = vunpack.c.h.b16 %v378_v45  ;;  %2279 = vmatprep.subr.bf16.mxu1 %v2550_v0  ;;  %956 = vmatprep.subr.bf16.mxu0 %v2550_v0  ;;  %s2019_s15 = sshll.u32 %s235_s22, 4  ;;  %s2003_s29 = scalar_lea.sflag [#allocation4], %s2673_s5  ;;  %s3727_s15 = int_to_ptr.vmem [resolvable:$true] %s2019_s15 }
  0x3e   : > { %v417_v53 = vunpack.c.h.b16 %v374_v46  ;;  %v379_v61 = vsel %vm2710_vm2, 0, %v328_v43  ;;  %v300_v4 = vor.u32 %v298_v56, %v2755_v55  ;;  %v267_v6 = vpack.c.bf16 %v254_v58, %v253_v54  ;;  %v2389_v43 = vld [vmem:[%s3782_s2 + $0x78] sm:$0xff]   ;;  %s2449_s30 = scalar_lea.vmem %s3727_s15, 1024  ;;  %s2554_s24 = smov [#allocation5]  }
  0x3f   : > { %v2728_v37 = vrot.slane %v281_v30, 7  ;;  %642 = vrot.lane.b32.xlu0 %v2748_v50, %s2551_s10  ;;  %v517_v59 = vshll.u32 %v2748_v50, 16  ;;  %v2767_v62 = vpack.c.b16 %v430_v41, %v429_v52  ;;  %v530_v1 = vshrl.u32 %v379_v61, 16  ;;  %p2450_p8 = scmp.ne.s32.totalorder %s3727_s15, %s2449_s30  ;;  %s2453_s7 = sshll.u32 %s2554_s24, 4  ;;  %s2454_s7 = int_to_ptr.vmem [resolvable:$false] %s2453_s7 }
  0x40   : > { %v2769_v63 = vpack.c.b16 %v418_v48, %v417_v53  ;;  %v533_v2 = vshll.u32 %v379_v61, 16  ;;  %v514_v8 = vshrl.u32 %v2748_v50, 16  ;;  %v332_v11 = vrot.slane %v330_v57, 7  ;;  %2291 = vmatpush1.bf16.msra.mxu1 %v2387_v3  ;;  %957 = vmatpush1.bf16.msra.mxu0 %v2387_v3  ;;  %v2144_v48 = vld [vmem:[%s2699_s8 + $0x18] sm:$0xff]  ;;  %s2455_s8 = scalar_lea.vmem %s2454_s7, 2048  ;;  %p2456_p3 = scmp.lt.s32.totalorder %s3727_s15, %s2454_s7 }
  0x41   : > { %v383_v47 = vsel %vm2710_vm2, %v2728_v37, 0  ;;  %v2781_v9 = vrot.slane %v517_v59, 1  ;;  %v2795_v13 = vrot.slane %v530_v1, 7  ;;  %v375_v15 = vsel %vm2710_vm2, 0, %v300_v4  ;;  %2280 = vmatprep.subr.bf16.mxu1 %v2550_v0  ;;  %958 = vmatprep.subr.bf16.mxu0 %v2550_v0  ;;  %p2451_p4 = pnand %p2450_p8, %p2640_p9  ;;  %p2457_p6 = scmp.lt.s32.totalorder %s2455_s8, %s2449_s30 }
  0x42   : > { %v2750_v51 = vcombine.low %v383_v47, %v374_v46  ;;  %v2797_v14 = vrot.slane %v533_v2, 1  ;;  %v522_v16 = vshrl.u32 %v2767_v62, 16  ;;  %v482_v17 = vshrl.u32 %v375_v15, 16 }
  0x43   : > { %644 = vrot.lane.b32.xlu0 %v2767_v62, %s2551_s10  ;;  %v485_v18 = vshll.u32 %v375_v15, 16  ;;  %v333_v19 = vshll.u32 %v2726_v35, 16  ;;  %v525_v22 = vshll.u32 %v2767_v62, 16  ;;  %v2805_v23 = vor.u32 %v533_v2, %v2795_v13  ;;  %v2390_v2 = vld [vmem:[%s3782_s2 + $0x70] sm:$0xff]   ;;  %v2393_v62 = vld [vmem:[%s3782_s2 + $0xb8] sm:$0xff]   ;;  %p2452_p5 = pneg %p2451_p4  ;;  %p2458_p7 = por %p2457_p6, %p2456_p3 }
  0x44   : > { %630 = vrot.lane.b32.xlu1 %v2750_v51, %s2551_s10  ;;  %v469_v60 = vshll.u32 %v2750_v51, 16  ;;  %v466_v10 = vshrl.u32 %v2750_v51, 16  ;;  %v2808_v24 = vor.u32 %v2797_v14, %v530_v1  ;;  %v302_v26 = vshrl.u32 %v267_v6, 16  ;;  %2292 = vmatpush1.bf16.msra.mxu1 %v2388_v12 }
  0x45   : > { %v2813_v28 = vrot.slane %v482_v17, 7  ;;  %v2815_v29 = vrot.slane %v485_v18, 1  ;;  %v335_v30 = vor.u32 %v333_v19, %v332_v11  ;;  %v389_v31 = vsel %vm2710_vm2, %v2724_v34, 0  ;;  %959 = vmatpush1.bf16.msra.mxu0 %v2388_v12  ;;  %2281 = vmatprep.subr.bf16.mxu1 %v2550_v0  ;;  %p2459_p10 = pnand %p2458_p7, %p2452_p5 }
  0x46   : > { %v2789_v5 = vrot.slane %v469_v60, 1  ;;  %v304_v33 = vrot.slane %v302_v26, 7  ;;  %v305_v35 = vshll.u32 %v267_v6, 16  ;;  %v385_v36 = vsel %vm2710_vm2, %v2755_v55, 0  ;;  %960 = vmatprep.subr.bf16.mxu0 %v2550_v0 }
  0x47   : > { %646 = vrot.lane.b32.xlu0 %v379_v61, %s2551_s10  ;;  %v390_v38 = vsel %vm2710_vm2, %v332_v11, 0  ;;  %v2829_v39 = vor.u32 %v485_v18, %v2813_v28  ;;  %v2832_v34 = vor.u32 %v2815_v29, %v482_v17  ;;  %v380_v40 = vsel %vm2710_vm2, 0, %v335_v30  ;;  %v2391_v18 = vld [vmem:[%s3782_s2 + $0x68] sm:$0xff]  }
  0x48   : > { %632 = vrot.lane.b32.xlu1 %v2769_v63, %s2551_s10  ;;  %v436_v41 = vunpack.c.l.b16 %v390_v38  ;;  %v2840_v44 = vcombine.low %v389_v31, %v380_v40  ;;  %v307_v45 = vor.u32 %v305_v35, %v304_v33  ;;  %v386_v46 = vsel %vm2710_vm2, %v304_v33, 0  ;;  %2293 = vmatpush1.bf16.msra.mxu1 %v2389_v43 }
  0x49   : > { %v435_v47 = vunpack.c.h.b16 %v380_v40  ;;  %v424_v49 = vunpack.c.l.b16 %v386_v46  ;;  %v314_v52 = vor.u32 %v312_v7, %v2718_v25  ;;  %v272_v53 = vpack.c.bf16 %v264_v32, %v263_v27  ;;  %961 = vmatpush1.bf16.msra.mxu0 %v2389_v43  ;;  %2282 = vmatprep.subr.bf16.mxu1 %v2550_v0 }
  0x4a   : > { %v474_v54 = vshrl.u32 %v2769_v63, 16  ;;  %v541_v55 = vshll.u32 %v2840_v44, 16  ;;  %v376_v56 = vsel %vm2710_vm2, 0, %v307_v45  ;;  %v477_v3 = vshll.u32 %v2769_v63, 16  ;;  %962 = vmatprep.subr.bf16.mxu0 %v2550_v0 }
  0x4b   : > { %648 = vrot.lane.b32.xlu0 %v2840_v44, %s2551_s10  ;;  %v2854_v57 = vpack.c.b16 %v436_v41, %v435_v47  ;;  %v2856_v58 = vcombine.low %v385_v36, %v376_v56  ;;  %v423_v61 = vunpack.c.h.b16 %v376_v56  ;;  %v2860_v1 = vsel %vm2710_vm2, 0, %v314_v52  ;;  %v2392_v52 = vld [vmem:[%s3782_s2 + $0x60] sm:$0xff]  }
  0x4c   : > { %634 = vrot.lane.b32.xlu1 %v375_v15, %s2551_s10  ;;  %v337_v25 = vshrl.u32 %v272_v53, 16  ;;  %v506_v6 = vshrl.u32 %v2860_v1, 16  ;;  %v279_v7 = vpack.c.bf16 %v2144_v48, %v2143_v42  ;;  %v2872_v11 = vrot.slane %v525_v22, 1  ;;  %2294 = vmatpush1.bf16.msra.mxu1 %v2390_v2 }
  0x4d   : > { %v3786_v4 = vshll.u32 %v2854_v57, 16  ;;  %v538_v12 = vshrl.u32 %v2840_v44, 16  ;;  %v493_v15 = vshll.u32 %v2856_v58, 16  ;;  %v2878_v17 = vpack.c.b16 %v424_v49, %v423_v61  ;;  %963 = vmatpush1.bf16.msra.mxu0 %v2390_v2  ;;  %2283 = vmatprep.subr.bf16.mxu1 %v2550_v0 }
  0x4e   : > { %v2885_v19 = vrot.slane %v541_v55, 1  ;;  %v490_v26 = vshrl.u32 %v2856_v58, 16  ;;  %v3787_v27 = vshrl.u32 %v2854_v57, 16  ;;  %v339_v30 = vrot.slane %v337_v25, 7  ;;  %964 = vmatprep.subr.bf16.mxu0 %v2550_v0 }
  0x4f   : > { %650 = vrot.lane.b32.xlu0 %v2854_v57, %s2551_s10  ;;  %v2893_v31 = vrot.slane %v493_v15, 1  ;;  %v2897_v32 = vrot.slane %v3786_v4, 1  ;;  %v508_v33 = vrot.slane %v506_v6, 7  ;;  %v509_v35 = vshll.u32 %v2860_v1, 16 }
  0x50   : > { %636 = vrot.lane.b32.xlu1 %v2856_v58, %s2551_s10  ;;  %v2905_v36 = vor.u32 %v2781_v9, %v514_v8  ;;  %v340_v38 = vshll.u32 %v272_v53, 16  ;;  %v344_v40 = vshrl.u32 %v279_v7, 16  ;;  %v605_v41 = vor.u32 %v2872_v11, %v522_v16  ;;  %2295 = vmatpush1.bf16.msra.mxu1 %v2391_v18 }
  0x51   : > { %v2915_v42 = vor.u32 %v2885_v19, %v538_v12  ;;  %v498_v43 = vshrl.u32 %v2878_v17, 16  ;;  %v347_v45 = vshll.u32 %v279_v7, 16  ;;  %v501_v46 = vshll.u32 %v2878_v17, 16  ;;  %965 = vmatpush1.bf16.msra.mxu0 %v2391_v18  ;;  %2284 = vmatprep.subr.bf16.mxu1 %v2550_v0 }
  0x52   : > { %v342_v47 = vor.u32 %v340_v38, %v339_v30  ;;  %v2921_v48 = vrot.slane %v344_v40, 7  ;;  %v284_v49 = vshll.u32 %v2714_v21, 16  ;;  %v391_v53 = vsel %vm2710_vm2, %v339_v30, 0  ;;  %966 = vmatprep.subr.bf16.mxu0 %v2550_v0 }
  0x53   : > { %v516_v56 = vrot.slane %v514_v8, 7  ;;  %v468_v61 = vrot.slane %v466_v10, 7  ;;  %v524_v25 = vrot.slane %v522_v16, 7  ;;  %v476_v8 = vrot.slane %v474_v54, 7 }
  0x54   : > { %638 = vrot.lane.b32.xlu1 %v2878_v17, %s2551_s10  ;;  %v2937_v21 = vsel %vm2710_vm2, 0, %v342_v47  ;;  %v349_v2 = vor.u32 %v347_v45, %v2921_v48  ;;  %v286_v7 = vor.u32 %v284_v49, %v2728_v37  ;;  %v2945_v18 = vrot.slane %v509_v35, 1  ;;  %2296 = vmatpush1.bf16.msra.mxu1 %v2392_v52 }
  0x55   : > { %v554_v16 = vshrl.u32 %v2937_v21, 16  ;;  %652 = vrot.lane.b32.xlu0 %v2937_v21, %s2551_s10  ;;  %v519_v37 = vor.u32 %v517_v59, %v516_v56  ;;  %v471_v30 = vor.u32 %v469_v60, %v468_v61  ;;  %v527_v45 = vor.u32 %v525_v22, %v524_v25  ;;  %967 = vmatpush1.bf16.msra.mxu0 %v2392_v52 }
  0x56   : > { %v2958_v38 = vsel %vm2710_vm2, 0, %v349_v2  ;;  %v2962_v40 = vsel %vm2710_vm2, 0, %v286_v7  ;;  %v479_v47 = vor.u32 %v477_v3, %v476_v8  ;;  %v2971_v50 = vor.u32 %v2897_v32, %v3787_v27  ;;  %2285 = vmatprep.subr.bf16.mxu1 %v2550_v0  ;;  %976 = vmatprep.subr.bf16.mxu0 %v2550_v0 }
  0x57   : > { %v557_v59 = vshll.u32 %v2937_v21, 16  ;;  %v2975_v60 = vcombine.low %v391_v53, %v2958_v38  ;;  %v459_v49 = vshrl.u32 %v2962_v40, 16  ;;  %v2983_v22 = vrot.slane %v501_v46, 1 }
  0x58   : > { %640 = vrot.lane.b32.xlu1 %v2860_v1, %s2551_s10  ;;  %v2988_v53 = vsel %vm371_vm1, %v508_v33, %v519_v37  ;;  %v2991_v2 = vsel %vm371_vm1, %v516_v56, %v527_v45  ;;  %v2994_v52 = vsel %vm371_vm1, %v468_v61, %v479_v47  ;;  %v593_v7 = vor.u32 %v2893_v31, %v490_v26 }
  0x59   : > { %v511_v4 = vor.u32 %v509_v35, %v508_v33  ;;  %v3002_v27 = vor.u32 %v2945_v18, %v506_v6  ;;  %v3006_v37 = vrot.slane %v554_v16, 7  ;;  %654 = vrot.lane.b32.xlu0 %v2975_v60, %s2551_s10  ;;  %v3015_v56 = vor.u32 %v2983_v22, %v498_v43  ;;  %v2394_v6 = vld [vmem:[%s3782_s2 + $0xb0] sm:$0xff]   ;;  %2297 = vmatpush2.bf16.msra.mxu1 %v2393_v62 }
  0x5a   : > { %v3019_v1 = vrot.slane %v459_v49, 7  ;;  %v3026_v33 = vsel %vm371_vm1, %v524_v25, %v2805_v23  ;;  %vm579_vm4 = vsmask.f32 7424  ;;  %v3028_v35 = vrot.slane %v557_v59, 1  ;;  %977 = vmatpush2.bf16.msra.mxu0 %v2393_v62  ;;  %2286 = vmatprep.subr.bf16.mxu1 %v2550_v0 }
  0x5b   : > { %v3033_v61 = vsel %vm579_vm4, %v2905_v36, %v2872_v11  ;;  %v3037_v45 = vsel %vm579_vm4, %v605_v41, %v2797_v14  ;;  %v462_v47 = vshll.u32 %v2962_v40, 16  ;;  %978 = vmatprep.subr.bf16.mxu0 %v2550_v0  ;;  %v559_v36 = vor.u32 %v557_v59, %v3006_v37 }
  0x5c   : > { %628 = vrot.lane.b32.xlu1 %v2962_v40, %s2551_s10  ;;  %v3044_v23 = vsel %vm371_vm1, %v3019_v1, %v471_v30  ;;  %v806_v25 = vrot.slane %v3033_v61, 4  ;;  %v810_v11 = vrot.slane %v3037_v45, 4  ;;  %v3051_v14 = vsel %vm371_vm1, %v476_v8, %v2829_v39 }
  0x5d   : > { %v584_v41 = vor.u32 %v2789_v5, %v466_v10  ;;  %v585_v62 = vrot.slane %v477_v3, 1  ;;  %v540_v59 = vrot.slane %v538_v12, 7  ;;  %v492_v39 = vrot.slane %v490_v26, 7  ;;  %2298 = vmatpush2.bf16.msra.mxu1 %v2394_v6  ;;  %v2395_v3 = vld [vmem:[%s3782_s2 + $0xa8] sm:$0xff]  }
  0x5e   : > { %v811_v30 = vsel %vm781_vm5, %v806_v25, %v810_v11  ;;  %v3070_v51 = vsel %vm579_vm4, %v2808_v24, %v2885_v19  ;;  %v565_v10 = vshll.u32 %v2975_v60, 16  ;;  %979 = vmatpush2.bf16.msra.mxu0 %v2394_v6  ;;  %v500_v26 = vrot.slane %v498_v43, 7  ;;  %2287 = vmatprep.subr.bf16.mxu1 %v2550_v0 }
  0x5f   : > { %v3077_v8 = vsel %vm579_vm4, %v584_v41, %v585_v62  ;;  %v587_v12 = vor.u32 %v585_v62, %v474_v54  ;;  %980 = vmatprep.subr.bf16.mxu0 %v2550_v0  ;;  %v543_v19 = vor.u32 %v541_v55, %v540_v59  ;;  %v495_v6 = vor.u32 %v493_v15, %v492_v39 }
  0x60   : > { %v785_v24 = vrot.slane %v3077_v8, 4  ;;  %v3093_v63 = vsel %vm579_vm4, %v2832_v34, %v2893_v31  ;;  %v562_v54 = vshrl.u32 %v2975_v60, 16  ;;  %v580_v43 = vrot.slane %v462_v47, 1  ;;  %2192 = vmatprep.mubr.msk.bf16.mxu1 %vm658_vm3, %v811_v30 }
  0x61   : > { %v3101_v41 = vsel %vm579_vm4, %v587_v12, %v2815_v29  ;;  %v503_v44 = vor.u32 %v501_v46, %v500_v26  ;;  %v3108_v34 = vsel %vm371_vm1, %v2795_v13, %v543_v19  ;;  %v3112_v58 = vsel %vm371_vm1, %v2813_v28, %v495_v6  ;;  %2299 = vmatpush2.bf16.msra.mxu1 %v2395_v3  ;;  %v2396_v29 = vld [vmem:[%s3782_s2 + $0xa0] sm:$0xff]  }
  0x62   : > { %v786_v55 = vrot.slane %v3101_v41, 4  ;;  %v3797_v15 = vshrl.u32 %v2854_v57, 16  ;;  %981 = vmatpush2.bf16.msra.mxu0 %v2395_v3  ;;  %v3123_v46 = vsel %vm371_vm1, %v500_v26, %v511_v4  ;;  %v3127_v13 = vsel %vm579_vm4, %v593_v7, %v2983_v22  ;;  %2288 = vmatprep.subr.bf16.mxu1 %v2550_v0 }
  0x63   : > { %v3120_v17 = vsel %vm371_vm1, %v492_v39, %v503_v44  ;;  %v392_v28 = vsel %vm2710_vm2, %v2921_v48, 0  ;;  %v617_v62 = vor.u32 %v3028_v35, %v554_v16  ;;  %v3135_v30 = vrot.slane %v565_v10, 1  ;;  %982 = vmatprep.subr.bf16.mxu0 %v2550_v0 }
  0x64   : > { %v548_v31 = vrot.slane %v3797_v15, 7  ;;  %v787_v4 = vsel %vm781_vm5, %v785_v24, %v786_v55  ;;  %v3798_v22 = vshll.u32 %v2854_v57, 16  ;;  %v3148_v48 = vsel %vm579_vm4, %v2915_v42, %v2897_v32 }
  0x65   : > { %2186 = vmatprep.mubr.msk.bf16.mxu0 %vm658_vm3, %v787_v4  ;;  %v441_v16 = vunpack.c.h.b16 %v2958_v38  ;;  %v442_v39 = vunpack.c.l.b16 %v392_v28  ;;  %v581_v3 = vor.u32 %v580_v43, %v459_v49  ;;  %v3162_v57 = vsel %vm579_vm4, %v3015_v56, %v2945_v18  ;;  %2300 = vmatpush2.bf16.msra.mxu1 %v2396_v29  ;;  %v2397_v43 = vld [vmem:[%s3782_s2 + $0x38] sm:$0xff]  }
  0x66   : > { %v551_v7 = vor.u32 %v3798_v22, %v548_v31  ;;  %v3151_v21 = vsel %vm371_vm1, %v548_v31, %v559_v36  ;;  %983 = vmatpush2.bf16.msra.mxu0 %v2396_v29  ;;  %v3169_v42 = vsel %vm579_vm4, %v2971_v50, %v3028_v35  ;;  %v3173_v38 = vrot.slane %v562_v54, 7  ;;  %1189 = vmatprep.subr.bf16.mxu1 %v2550_v0 }
  0x67   : > { %v3164_v32 = vpack.c.b16 %v442_v39, %v441_v16  ;;  %1424 = vmatprep.subr.bf16.mxu0 %v2550_v0  ;;  %v3180_v18 = vsel %vm579_vm4, %v3002_v27, %v2781_v9  ;;  %v3184_v49 = vsel %vm579_vm4, %v617_v62, %v3135_v30  ;;  %v3192_v56 = vor.u32 %v462_v47, %v3019_v1  ;;  %v2401_v39 = vld [vmem:[%s3782_s2 + $0x28] sm:$0xff]  }
  0x68   : > { %v3157_v12 = vsel %vm371_vm1, %v540_v59, %v551_v7  ;;  %v567_v50 = vor.u32 %v565_v10, %v3173_v38  ;;  %v3196_v35 = vsel %vm579_vm4, %v581_v3, %v2789_v5  ;;  %v814_v47 = vrot.slane %v3070_v51, 4  ;;  %v2402_v3 = vld [vmem:[%s3782_s2 + $0xe8] sm:$0xff]  }
  0x69   : > { %656 = vrot.lane.b32.xlu0 %v3164_v32, %s2551_s10  ;;  %v578_v27 = vsel %vm2710_vm2, 0, %v3192_v56  ;;  %v790_v24 = vrot.slane %v3093_v63, 4  ;;  %v818_v7 = vrot.slane %v3148_v48, 4  ;;  %vm625_vm6 = vcmask 1047552  }
  0x6a   : > { %v3200_v9 = vsel %vm371_vm1, %v3006_v37, %v567_v50  ;;  %v815_v29 = vsel %vm781_vm5, %v810_v11, %v814_v47  ;;  %v2399_v11 = vld [vmem:[%s3782_s2 + $0x30] sm:$0xff]   ;;  %vm626_vm7 = vmand %vm625_vm6, %vm579_vm4  ;;  %vm1625_vm8 = vcmask 1046528  }
  0x6b   : > { %v791_v4 = vsel %vm781_vm5, %v786_v55, %v790_v24  ;;  %v794_v55 = vrot.slane %v3127_v13, 4 }
  0xb1   : > { %v643_v36 = vpop.permute.xlu0 %642 }
  0xb2   : > { %v3207_v10 = vsel %vm658_vm3, %v2988_v53, %v643_v36 }
  0xb3   : > { %v804_v53 = vrot.slane %v3207_v10, 4 }
  0xb5   : > { %v645_v5 = vpop.permute.xlu0 %644 }
  0xb6   : > { %v631_v59 = vpop.permute.xlu1 %630  ;;  %v3216_v37 = vsel %vm658_vm3, %v2991_v2, %v645_v5  ;;  %v2398_v2 = vld [vmem:[%s3782_s2 + $0xf8] sm:$0xff]   ;;  %v795_v5 = vsel %vm781_vm5, %v790_v24, %v794_v55  ;;  %v2404_v24 = vld [vmem:[%s3782_s2 + $0xe0] sm:$0xff]  }
  0xb7   : > { %v3211_v40 = vsel %vm658_vm3, %v3044_v23, %v631_v59  ;;  %v808_v23 = vrot.slane %v3216_v37, 4 }
  0xb8   : > { %v782_v19 = vrot.slane %v3211_v40, 4 }
  0xb9   : > { %v809_v31 = vsel %vm781_vm5, %v804_v53, %v808_v23 }
  0xba   : > { %v633_v1 = vpop.permute.xlu1 %632  ;;  %1033 = vmatmul.mubr.bf16.vlgmr.msra.gmra.mxu1 %v809_v31 }
  0xbb   : > { %v3220_v26 = vsel %vm658_vm3, %v2994_v52, %v633_v1  ;;  %v647_v52 = vpop.permute.xlu0 %646  ;;  %1190 = vmatpush1.bf16.msra.mxu1 %v2397_v43  ;;  %2193 = vmatprep.mubr.msk.bf16.mxu1 %vm658_vm3, %v815_v29  ;;  %v819_v43 = vsel %vm781_vm5, %v814_v47, %v818_v7  ;;  %v798_v47 = vrot.slane %v3162_v57, 4 }
  0xbc   : > { %v783_v6 = vrot.slane %v3220_v26, 4  ;;  %v3242_v28 = vsel %vm658_vm3, %v3026_v33, %v647_v52  ;;  %v2400_v33 = vld [vmem:[%s3782_s2 + $0xf0] sm:$0xff]   ;;  %1191 = vmatprep.subr.bf16.mxu1 %v2550_v0  ;;  %v2405_v52 = vld [vmem:[%s3782_s2 + $0x18] sm:$0xff]  }
  0xbe   : > { %v635_v44 = vpop.permute.xlu1 %634  ;;  %v784_v15 = vsel %vm781_vm5, %v782_v19, %v783_v6 }
  0xbf   : > { %v3246_v62 = vsel %vm658_vm3, %v3051_v14, %v635_v44  ;;  %985 = vmatmul.mubr.bf16.vlgmr.msra.gmra.mxu0 %v784_v15  ;;  %v812_v14 = vrot.slane %v3242_v28, 4  ;;  %v649_v16 = vpop.permute.xlu0 %648  ;;  %1192 = vmatpush1.bf16.msra.mxu1 %v2399_v11  ;;  %v2406_v44 = vld [vmem:[%s3782_s2 + $0xd8] sm:$0xff]  }
  0xc0   : > { %1425 = vmatpush1.bf16.msra.mxu0 %v2398_v2  ;;  %v788_v22 = vrot.slane %v3246_v62, 4  ;;  %2187 = vmatprep.mubr.msk.bf16.mxu0 %vm658_vm3, %v791_v4  ;;  %v3278_v1 = vsel %vm658_vm3, %v3108_v34, %v649_v16  ;;  %v799_v4 = vsel %vm781_vm5, %v794_v55, %v798_v47 }
  0xc1   : > { %1426 = vmatprep.subr.bf16.mxu0 %v2550_v0  ;;  %1193 = vmatprep.subr.bf16.mxu1 %v2550_v0  ;;  %v813_v59 = vsel %vm781_vm5, %v808_v23, %v812_v14  ;;  %v2403_v23 = vld [vmem:[%s3782_s2 + $0x20] sm:$0xff]   ;;  %v816_v34 = vrot.slane %v3278_v1, 4 }
  0xc2   : > { %v637_v50 = vpop.permute.xlu1 %636  ;;  %v789_v36 = vsel %vm781_vm5, %v783_v6, %v788_v22  ;;  %1041 = vmatmul.mubr.bf16.gmra.mxu1 %v813_v59  ;;  %v822_v6 = vrot.slane %v3169_v42, 4  ;;  %v2409_v59 = vld [vmem:[%s3782_s2 + $0x8] sm:$0xff]  }
  0xc3   : > { %v3282_v19 = vsel %vm658_vm3, %v3112_v58, %v637_v50  ;;  %1194 = vmatpush1.bf16.msra.mxu1 %v2401_v39  ;;  %2194 = vmatprep.mubr.msk.bf16.mxu1 %vm658_vm3, %v819_v43  ;;  %v651_v2 = vpop.permute.xlu0 %650  ;;  %v817_v29 = vsel %vm781_vm5, %v812_v14, %v816_v34  ;;  %v2407_v14 = vld [vmem:[%s3782_s2 + $0x10] sm:$0xff]   ;;  %v826_v39 = vrot.slane %v3184_v49, 4 }
  0xc4   : > { %1427 = vmatpush1.bf16.msra.mxu0 %v2400_v33  ;;  %1195 = vmatprep.subr.bf16.mxu1 %v2550_v0  ;;  %v792_v58 = vrot.slane %v3282_v19, 4  ;;  %v3316_v33 = vsel %vm658_vm3, %v3157_v12, %v651_v2  ;;  %v823_v16 = vsel %vm781_vm5, %v818_v7, %v822_v6  ;;  %v802_v7 = vrot.slane %v3180_v18, 4  ;;  %v2411_v2 = vld [vmem:[%s3782_s2] sm:$0xff]  }
  0xc5   : > { %1428 = vmatprep.subr.bf16.mxu0 %v2550_v0  ;;  %v820_v55 = vrot.slane %v3316_v33, 4 }
  0xc6   : > { %v639_v15 = vpop.permute.xlu1 %638  ;;  %v793_v31 = vsel %vm781_vm5, %v788_v22, %v792_v58  ;;  %v573_v22 = vshll.u32 %v3164_v32, 16 }
  0xc7   : > { %993 = vmatmul.mubr.bf16.gmra.mxu0 %v789_v36  ;;  %1196 = vmatpush1.bf16.msra.mxu1 %v2403_v23  ;;  %v3312_v11 = vsel %vm658_vm3, %v3120_v17, %v639_v15  ;;  %v2408_v17 = vld [vmem:[%s3782_s2 + $0xd0] sm:$0xff]   ;;  %v653_v50 = vpop.permute.xlu0 %652  ;;  %v803_v23 = vsel %vm781_vm5, %v798_v47, %v802_v7  ;;  %v2414_v15 = vld [vmem:[%s3782_s2 + $0x118] sm:$0xff]  }
  0xc8   : > { %1429 = vmatpush1.bf16.msra.mxu0 %v2402_v3  ;;  %2188 = vmatprep.mubr.msk.bf16.mxu0 %vm658_vm3, %v795_v5  ;;  %v796_v12 = vrot.slane %v3312_v11, 4  ;;  %v620_v3 = vor.u32 %v3135_v30, %v562_v54  ;;  %v3339_v36 = vrot.slane %v573_v22, 1  ;;  %v2410_v5 = vld [vmem:[%s3782_s2 + $0xc8] sm:$0xff]   ;;  %v821_v30 = vsel %vm781_vm5, %v816_v34, %v820_v55  ;;  %v2412_v34 = vld [vmem:[%s3782_s2 + $0xc0] sm:$0xff]  }
  0xc9   : > { %1430 = vmatprep.subr.bf16.mxu0 %v2550_v0  ;;  %1197 = vmatprep.subr.bf16.mxu1 %v2550_v0  ;;  %v3353_v43 = vsel %vm658_vm3, %v3151_v21, %v653_v50  ;;  %v2420_v50 = vld [vmem:[%s3782_s2 + $0x100] sm:$0xff]  }
  0xca   : > { %1049 = vmatmul.mubr.bf16.gmra.mxu1 %v817_v29  ;;  %v641_v60 = vpop.permute.xlu1 %640  ;;  %v797_v54 = vsel %vm781_vm5, %v792_v58, %v796_v12  ;;  %v3365_v21 = vsel %vm579_vm4, %v620_v3, %v3339_v36  ;;  %v824_v47 = vrot.slane %v3353_v43, 4  ;;  %v2419_v3 = vld [vmem:[%s3782_s2 + $0x40] sm:$0xff]  }
  0xcb   : > { %1198 = vmatpush1.bf16.msra.mxu1 %v2405_v52  ;;  %2195 = vmatprep.mubr.msk.bf16.mxu1 %vm658_vm3, %v823_v16  ;;  %v3369_v58 = vsel %vm658_vm3, %v3123_v46, %v641_v60  ;;  %v2413_v46 = vld [vmem:[%s3782_s2 + $0x58] sm:$0xff]   ;;  %v807_v16 = vsel %vm781_vm5, %v802_v7, %v806_v25  ;;  %v2417_v25 = vld [vmem:[%s3782_s2 + $0x48] sm:$0xff]  }
  0xcc   : > { %1431 = vmatpush1.bf16.msra.mxu0 %v2404_v24  ;;  %1199 = vmatprep.subr.bf16.mxu1 %v2550_v0  ;;  %v827_v24 = vsel %vm781_vm5, %v822_v6, %v826_v39  ;;  %v830_v6 = vrot.slane %v3365_v21, 4  ;;  %v800_v52 = vrot.slane %v3369_v58, 4  ;;  %v825_v29 = vsel %vm781_vm5, %v820_v55, %v824_v47  ;;  %v2418_v55 = vld [vmem:[%s3782_s2 + $0x108] sm:$0xff]  }
  0xcd   : > { %1432 = vmatprep.subr.bf16.mxu0 %v2550_v0 }
  0xce   : > { %v805_v7 = vsel %vm781_vm5, %v800_v52, %v804_v53 }
  0xcf   : > { %1001 = vmatmul.mubr.bf16.gmra.mxu0 %v793_v31  ;;  %1200 = vmatpush1.bf16.msra.mxu1 %v2407_v14  ;;  %v801_v31 = vsel %vm781_vm5, %v796_v12, %v800_v52  ;;  %v831_v14 = vsel %vm781_vm5, %v826_v39, %v830_v6  ;;  %v2416_v12 = vld [vmem:[%s3782_s2 + $0x110] sm:$0xff]  }
  0xd0   : > { %1433 = vmatpush1.bf16.msra.mxu0 %v2406_v44  ;;  %2189 = vmatprep.mubr.msk.bf16.mxu0 %vm658_vm3, %v799_v4  ;;  %v655_v44 = vpop.permute.xlu0 %654 }
  0xd1   : > { %1434 = vmatprep.subr.bf16.mxu0 %v2550_v0  ;;  %1201 = vmatprep.subr.bf16.mxu1 %v2550_v0  ;;  %v3390_v4 = vsel %vm658_vm3, %v3200_v9, %v655_v44 }
  0xd2   : > { %1057 = vmatmul.mubr.bf16.gmra.mxu1 %v821_v30  ;;  %v828_v9 = vrot.slane %v3390_v4, 4 }
  0xd3   : > { %1202 = vmatpush1.bf16.msra.mxu1 %v2409_v59  ;;  %2196 = vmatprep.mubr.msk.bf16.mxu1 %vm658_vm3, %v827_v24  ;;  %v629_v59 = vpop.permute.xlu1 %628 }
  0xd4   : > { %1435 = vmatpush1.bf16.msra.mxu0 %v2408_v17  ;;  %1203 = vmatprep.subr.bf16.mxu1 %v2550_v0  ;;  %v2415_v17 = vld [vmem:[%s3782_s2 + $0x50] sm:$0xff]   ;;  %v829_v39 = vsel %vm781_vm5, %v824_v47, %v828_v9  ;;  %v661_v53 = vsel %vm658_vm3, %v578_v27, %v629_v59 }
  0xd5   : > { %1436 = vmatprep.subr.bf16.mxu0 %v2550_v0 }
  0xd7   : > { %1009 = vmatmul.mubr.bf16.gmra.mxu0 %v797_v54  ;;  %1204 = vmatpush1.bf16.msra.mxu1 %v2411_v2 }
  0xd8   : > { %1437 = vmatpush1.bf16.msra.mxu0 %v2410_v5  ;;  %2190 = vmatprep.mubr.msk.bf16.mxu0 %vm658_vm3, %v803_v23 }
  0xd9   : > { %1438 = vmatprep.subr.bf16.mxu0 %v2550_v0  ;;  %1213 = vmatprep.subr.bf16.mxu1 %v2550_v0 }
  0xda   : > { %1065 = vmatmul.mubr.bf16.gmra.mxu1 %v825_v29 }
  0xdb   : > { %1214 = vmatpush2.bf16.msra.mxu1 %v2413_v46  ;;  %2197 = vmatprep.mubr.msk.bf16.mxu1 %vm658_vm3, %v831_v14 }
  0xdc   : > { %1439 = vmatpush1.bf16.msra.mxu0 %v2412_v34  ;;  %1215 = vmatprep.subr.bf16.mxu1 %v2550_v0 }
  0xdd   : > { %1448 = vmatprep.subr.bf16.mxu0 %v2550_v0 }
  0xdf   : > { %1017 = vmatmul.mubr.bf16.gmra.mxu0 %v801_v31  ;;  %1216 = vmatpush2.bf16.msra.mxu1 %v2415_v17 }
  0xe0   : > { %1449 = vmatpush2.bf16.msra.mxu0 %v2414_v15  ;;  %2191 = vmatprep.mubr.msk.bf16.mxu0 %vm658_vm3, %v807_v16 }
  0xe1   : > { %1450 = vmatprep.subr.bf16.mxu0 %v2550_v0  ;;  %1217 = vmatprep.subr.bf16.mxu1 %v2550_v0 }
  0xe2   : > { %1073 = vmatmul.mubr.bf16.gmra.mxu1 %v829_v39 }
  0xe3   : > { %1218 = vmatpush2.bf16.msra.mxu1 %v2417_v25  ;;  %2210 = vmatprep.mubr.msk.bf16.mxu1 %vm658_vm3, %v3196_v35 }
  0xe4   : > { %1451 = vmatpush2.bf16.msra.mxu0 %v2416_v12  ;;  %1219 = vmatprep.subr.bf16.mxu1 %v2550_v0 }
  0xe5   : > { %1452 = vmatprep.subr.bf16.mxu0 %v2550_v0 }
  0xe7   : > { %1025 = vmatmul.mubr.bf16.gmra.mxu0 %v805_v7  ;;  %1220 = vmatpush2.bf16.msra.mxu1 %v2419_v3 }
  0xe8   : > { %1453 = vmatpush2.bf16.msra.mxu0 %v2418_v55  ;;  %2258 = vmatprep.mubr.msk.bf16.mxu0 %vm658_vm3, %v3093_v63 }
  0xe9   : > { %1454 = vmatprep.subr.bf16.mxu0 %v2550_v0  ;;  %v570_v0 = vshrl.u32 %v3164_v32, 16 }
  0xea   : > { %1222 = vmatmul.mubr.bf16.vlgmr.msra.gmra.mxu1 %v661_v53 }
  0xeb   : > { %2211 = vmatprep.mubr.msk.bf16.mxu1 %vm658_vm3, %v3077_v8  ;;  %v572_v20 = vrot.slane %v570_v0, 7  ;;  %v657_v8 = vpop.permute.xlu0 %656 }
  0xec   : > { %1455 = vmatpush2.bf16.msra.mxu0 %v2420_v50 }
  0xef   : > { %1457 = vmatmul.mubr.bf16.vlgmr.msra.gmra.mxu0 %v3246_v62 }
  0xf0   : > { %2259 = vmatprep.mubr.msk.bf16.mxu0 %vm658_vm3, %v3127_v13 }
  0xf2   : > { %1230 = vmatmul.mubr.bf16.gmra.mxu1 %v3211_v40 }
  0xf3   : > { %2212 = vmatprep.mubr.msk.bf16.mxu1 %vm658_vm3, %v3101_v41 }
  0xf7   : > { %1465 = vmatmul.mubr.bf16.gmra.mxu0 %v3282_v19 }
  0xf8   : > { %2260 = vmatprep.mubr.msk.bf16.mxu0 %vm658_vm3, %v3162_v57 }
  0xfa   : > { %1238 = vmatmul.mubr.bf16.gmra.mxu1 %v3220_v26 }
  0xfb   : > { %2213 = vmatprep.mubr.msk.bf16.mxu1 %vm658_vm3, %v3093_v63 }
  0xff   : > { %1473 = vmatmul.mubr.bf16.gmra.mxu0 %v3312_v11 }
 0x100   : > { %2261 = vmatprep.mubr.msk.bf16.mxu0 %vm658_vm3, %v3180_v18 }
 0x102   : > { %1246 = vmatmul.mubr.bf16.gmra.mxu1 %v3246_v62 }
 0x103   : > { %2214 = vmatprep.mubr.msk.bf16.mxu1 %vm658_vm3, %v3127_v13 }
 0x107   : > { %1481 = vmatmul.mubr.bf16.gmra.mxu0 %v3369_v58 }
 0x108   : > { %2262 = vmatprep.mubr.msk.bf16.mxu0 %vm658_vm3, %v3033_v61 }
 0x10a   : > { %1254 = vmatmul.mubr.bf16.gmra.mxu1 %v3282_v19 }
 0x10b   : > { %2215 = vmatprep.mubr.msk.bf16.mxu1 %vm658_vm3, %v3162_v57 }
 0x10f   : > { %1489 = vmatmul.mubr.bf16.gmra.mxu0 %v3207_v10 }
 0x110   : > { %2263 = vmatprep.mubr.msk.bf16.mxu0 %vm658_vm3, %v3037_v45 }
 0x112   : > { %1262 = vmatmul.mubr.bf16.gmra.mxu1 %v3312_v11 }
 0x113   : > { %2216 = vmatprep.mubr.msk.bf16.mxu1 %vm658_vm3, %v3180_v18 }
 0x117   : > { %1497 = vmatmul.mubr.bf16.gmra.mxu0 %v3216_v37 }
 0x118   : > { %2264 = vmatprep.mubr.msk.bf16.mxu0 %vm658_vm3, %v3070_v51 }
 0x11a   : > { %1270 = vmatmul.mubr.bf16.gmra.mxu1 %v3369_v58 }
 0x11b   : > { %2217 = vmatprep.mubr.msk.bf16.mxu1 %vm658_vm3, %v3033_v61  ;;  %v623_v61 = vor.u32 %v3339_v36, %v570_v0 }
 0x11f   : > { %1505 = vmatmul.mubr.bf16.gmra.mxu0 %v3242_v28 }
 0x120   : > { %2265 = vmatprep.mubr.msk.bf16.mxu0 %vm658_vm3, %v3148_v48 }
 0x122   : > { %1278 = vmatmul.mubr.bf16.gmra.mxu1 %v3207_v10 }
 0x123   : > { %2218 = vmatprep.mubr.msk.bf16.mxu1 %vm658_vm3, %v3037_v45  ;;  %v627_v45 = vsel %vm626_vm7, %v623_v61, 0 }
 0x127   : > { %1513 = vmatmul.mubr.bf16.gmra.mxu0 %v3278_v1 }
 0x128   : > { %2266 = vmatprep.mubr.msk.bf16.mxu0 %vm658_vm3, %v3169_v42 }
 0x12a   : > { %1286 = vmatmul.mubr.bf16.gmra.mxu1 %v3216_v37 }
 0x12b   : > { %2219 = vmatprep.mubr.msk.bf16.mxu1 %vm658_vm3, %v3070_v51  ;;  %v575_v51 = vor.u32 %v573_v22, %v572_v20 }
 0x12d   : > { %v576_v63 = vsel %vm371_vm1, %v3173_v38, %v575_v51 }
 0x12e   : > { %v717_v41 = vsel %vm658_vm3, %v576_v63, %v657_v8 }
 0x12f   : > { %1521 = vmatmul.mubr.bf16.gmra.mxu0 %v3316_v33 }
 0x130   : > { %2267 = vmatprep.mubr.msk.bf16.mxu0 %vm658_vm3, %v3184_v49 }
 0x132   : > { %1294 = vmatmul.mubr.bf16.gmra.mxu1 %v3242_v28 }
 0x133   : > { %2220 = vmatprep.mubr.msk.bf16.mxu1 %vm658_vm3, %v3148_v48 }
 0x137   : > { %1529 = vmatmul.mubr.bf16.gmra.mxu0 %v3353_v43 }
 0x138   : > { %2268 = vmatprep.mubr.msk.bf16.mxu0 %vm658_vm3, %v3365_v21 }
 0x13a   : > { %1302 = vmatmul.mubr.bf16.gmra.mxu1 %v3278_v1 }
 0x13b   : > { %2221 = vmatprep.mubr.msk.bf16.mxu1 %vm658_vm3, %v3169_v42 }
 0x13f   : > { %1537 = vmatmul.mubr.bf16.gmra.mxu0 %v3390_v4 }
 0x140   : > { %2269 = vmatprep.mubr.msk.bf16.mxu0 %vm658_vm3, %v627_v45 }
 0x142   : > { %1310 = vmatmul.mubr.bf16.gmra.mxu1 %v3316_v33 }
 0x147   : > { %1545 = vmatmul.mubr.bf16.gmra.mxu0 %v717_v41 }
 0x17a   : > { %v3509_v48 = vpop.f32.mrf.mxu1 }
 0x17c   : > { %v1036_v32 = vpop.f32.mrf.mxu1 }
 0x17e   : > { %v3511_v49 = vpop.f32.mrf.mxu1 }
 0x17f   : > { %v986_v13 = vpop.f32.mrf.mxu0 }
 0x180   : > { %v1039_v56 = vpop.f32.mrf.mxu1 }
 0x181   : > { %v988_v57 = vpop.f32.mrf.mxu0 }
 0x182   : > { %v3513_v27 = vpop.f32.mrf.mxu1 }
 0x183   : > { %v989_v18 = vpop.f32.mrf.mxu0 }
 0x184   : > { %v1044_v38 = vpop.f32.mrf.mxu1 }
 0x185   : > { %v991_v42 = vpop.f32.mrf.mxu0 }
 0x186   : > { %v3517_v37 = vpop.f32.mrf.mxu1 }
 0x187   : > { %v994_v35 = vpop.f32.mrf.mxu0 }
 0x188   : > { %v1047_v28 = vpop.f32.mrf.mxu1 }
 0x189   : > { %v996_v10 = vpop.f32.mrf.mxu0 }
 0x18a   : > { %v3521_v1 = vpop.f32.mrf.mxu1 }
 0x18b   : > { %v3515_v40 = vpop.f32.mrf.mxu0 }
 0x18c   : > { %v1052_v11 = vpop.f32.mrf.mxu1 }
 0x18d   : > { %v999_v26 = vpop.f32.mrf.mxu0 }
 0x18e   : > { %v3525_v22 = vpop.f32.mrf.mxu1 }
 0x18f   : > { %v3519_v62 = vpop.f32.mrf.mxu0 }
 0x190   : > { %v1055_v5 = vpop.f32.mrf.mxu1 }
 0x191   : > { %v1004_v19 = vpop.f32.mrf.mxu0 }
 0x192   : > { %v3529_v54 = vpop.f32.mrf.mxu1 }
 0x193   : > { %v3523_v33 = vpop.f32.mrf.mxu0 }
 0x194   : > { %v1060_v43 = vpop.f32.mrf.mxu1 }
 0x195   : > { %v1007_v36 = vpop.f32.mrf.mxu0 }
 0x196   : > { %v3533_v24 = vpop.f32.mrf.mxu1 }
 0x197   : > { %v3527_v60 = vpop.f32.mrf.mxu0 }
 0x198   : > { %v1063_v34 = vpop.f32.mrf.mxu1 }
 0x199   : > { %v1012_v30 = vpop.f32.mrf.mxu0 }
 0x19a   : > { %v3537_v58 = vpop.f32.mrf.mxu1 }
 0x19b   : > { %v3531_v23 = vpop.f32.mrf.mxu0 }
 0x19c   : > { %v1068_v6 = vpop.f32.mrf.mxu1 }
 0x19d   : > { %v1015_v2 = vpop.f32.mrf.mxu0 }
 0x19e   : > { %v3541_v44 = vpop.f32.mrf.mxu1 }
 0x19f   : > { %v3535_v21 = vpop.f32.mrf.mxu0 }
 0x1a0   : > { %v1071_v15 = vpop.f32.mrf.mxu1 }
 0x1a1   : > { %v1020_v47 = vpop.f32.mrf.mxu0 }
 0x1a2   : > { %v3545_v29 = vpop.f32.mrf.mxu1 }
 0x1a3   : > { %v3539_v52 = vpop.f32.mrf.mxu0 }
 0x1a4   : > { %v1076_v16 = vpop.f32.mrf.mxu1 }
 0x1a5   : > { %v1023_v46 = vpop.f32.mrf.mxu0 }
 0x1a6   : > { %v3549_v17 = vpop.f32.mrf.mxu1 }
 0x1a7   : > { %v3543_v31 = vpop.f32.mrf.mxu0 }
 0x1a8   : > { %v1079_v9 = vpop.f32.mrf.mxu1 }
 0x1a9   : > { %v1028_v4 = vpop.f32.mrf.mxu0 }
 0x1aa   : > { %v1223_v25 = vpop.f32.mrf.mxu1 }
 0x1ab   : > { %v3547_v14 = vpop.f32.mrf.mxu0  ;;  %v1224_v7 = vadd.f32 %v1223_v25, %v986_v13 }
 0x1ac   : > { %v1225_v39 = vpop.f32.mrf.mxu1 }
 0x1ad   : > { %v1031_v12 = vpop.f32.mrf.mxu0 }
 0x1ae   : > { %v1226_v59 = vpop.f32.mrf.mxu1 }
 0x1af   : > { %v1458_v55 = vpop.f32.mrf.mxu0  ;;  %v1227_v0 = vadd.f32 %v1226_v59, %v989_v18 }
 0x1b0   : > { %v1553_v50 = vadd.f32 %v1458_v55, %v1224_v7  ;;  %v1228_v20 = vpop.f32.mrf.mxu1 }
 0x1b1   : > { %v1460_v3 = vpop.f32.mrf.mxu0 }
 0x1b2   : > { %v1577_v45 = vmax.f32 %v1553_v50, 0.0  ;;  %v1231_v8 = vpop.f32.mrf.mxu1 }
 0x1b3   : > { %v1461_v53 = vpop.f32.mrf.mxu0  ;;  %v1232_v57 = vadd.f32 %v1231_v8, %v994_v35 }
 0x1b4   : > { %v1554_v51 = vadd.f32 %v1461_v53, %v1227_v0  ;;  %v1233_v32 = vpop.f32.mrf.mxu1  ;;  %v1626_v56 = vrot.slane %v1577_v45, 1 }
 0x1b5   : > { %v1463_v61 = vpop.f32.mrf.mxu0 }
 0x1b6   : > { %v1578_v41 = vmax.f32 %v1554_v51, 0.0  ;;  %v1234_v38 = vpop.f32.mrf.mxu1 }
 0x1b7   : > { %v1466_v63 = vpop.f32.mrf.mxu0  ;;  %v1235_v19 = vadd.f32 %v1234_v38, %v3515_v40 }
 0x1b8   : > { %v1627_v10 = vrot.slane %v1578_v41, 1  ;;  %v1555_v13 = vadd.f32 %v1466_v63, %v1232_v57  ;;  %v1236_v11 = vpop.f32.mrf.mxu1 }
 0x1b9   : > { %v1468_v42 = vpop.f32.mrf.mxu0 }
 0x1ba   : > { %v3552_v28 = vsel %vm1625_vm8, %v1626_v56, %v1627_v10  ;;  %v1579_v18 = vmax.f32 %v1555_v13, 0.0  ;;  %v1239_v43 = vpop.f32.mrf.mxu1 }
 0x1bb   : > { %v1469_v26 = vpop.f32.mrf.mxu0  ;;  %v1240_v34 = vadd.f32 %v1239_v43, %v3519_v62 }
 0x1bc   : > { %v1629_v5 = vrot.slane %v1579_v18, 1  ;;  %v1556_v30 = vadd.f32 %v1469_v26, %v1235_v19  ;;  %v1241_v47 = vpop.f32.mrf.mxu1 }
 0x1bd   : > { %v1471_v36 = vpop.f32.mrf.mxu0 }
 0x1be   : > { %v3556_v2 = vsel %vm1625_vm8, %v1627_v10, %v1629_v5  ;;  %v1580_v46 = vmax.f32 %v1556_v30, 0.0  ;;  %v1242_v4 = vpop.f32.mrf.mxu1 }
 0x1bf   : > { %v1474_v35 = vpop.f32.mrf.mxu0  ;;  %v1243_v40 = vadd.f32 %v1242_v4, %v3523_v33 }
 0x1c0   : > { %v1557_v15 = vadd.f32 %v1474_v35, %v1240_v34  ;;  %v1244_v9 = vpop.f32.mrf.mxu1  ;;  %v1631_v55 = vrot.slane %v1580_v46, 1 }
 0x1c1   : > { %v1476_v6 = vpop.f32.mrf.mxu0 }
 0x1c2   : > { %v1581_v12 = vmax.f32 %v1557_v15, 0.0  ;;  %v1247_v3 = vpop.f32.mrf.mxu1  ;;  %v2552_v15 = vmov 1983009808  }
 0x1c3   : > { %v1477_v16 = vpop.f32.mrf.mxu0  ;;  %v1248_v53 = vadd.f32 %v1247_v3, %v3527_v60  ;;  %v1685_v4 = vunpack.c.l.s4 %v2552_v15 }
 0x1c4   : > { %v1632_v7 = vrot.slane %v1581_v12, 1  ;;  %v1558_v39 = vadd.f32 %v1477_v16, %v1243_v40  ;;  %v1249_v0 = vpop.f32.mrf.mxu1  ;;  %v1687_v16 = vlaneseq }
 0x1c5   : > { %v1479_v25 = vpop.f32.mrf.mxu0 }
 0x1c6   : > { %v3561_v59 = vsel %vm1625_vm8, %v1631_v55, %v1632_v7  ;;  %v1582_v62 = vmax.f32 %v1558_v39, 0.0  ;;  %v1250_v51 = vpop.f32.mrf.mxu1 }
 0x1c7   : > { %v1482_v50 = vpop.f32.mrf.mxu0  ;;  %v1251_v63 = vadd.f32 %v1250_v51, %v3531_v23 }
 0x1c8   : > { %v1634_v61 = vrot.slane %v1582_v62, 1  ;;  %v1559_v45 = vadd.f32 %v1482_v50, %v1248_v53  ;;  %v1252_v41 = vpop.f32.mrf.mxu1  ;;  %v1686_v50 = vunpack.c.0.s8 %v1685_v4  ;;  %v3577_v62 = vshrl.u32 %v1687_v16, 7 }
 0x1c9   : > { %v1484_v20 = vpop.f32.mrf.mxu0 }
 0x1ca   : > { %v3565_v33 = vsel %vm1625_vm8, %v1632_v7, %v1634_v61  ;;  %v1583_v32 = vmax.f32 %v1559_v45, 0.0  ;;  %v1255_v56 = vpop.f32.mrf.mxu1  ;;  %v3581_v41 = vsub.s32 %v1686_v50, %v3577_v62 }
 0x1cb   : > { %v1485_v8 = vpop.f32.mrf.mxu0  ;;  %v1256_v60 = vadd.f32 %v1255_v56, %v3535_v21 }
 0x1cc   : > { %v1560_v42 = vadd.f32 %v1485_v8, %v1251_v63  ;;  %v1257_v38 = vpop.f32.mrf.mxu1  ;;  %v1636_v18 = vrot.slane %v1583_v32, 1 }
 0x1cd   : > { %v1487_v57 = vpop.f32.mrf.mxu0 }
 0x1ce   : > { %v1584_v13 = vmax.f32 %v1560_v42, 0.0  ;;  %v1258_v36 = vpop.f32.mrf.mxu1 }
 0x1cf   : > { %v1490_v10 = vpop.f32.mrf.mxu0  ;;  %v1259_v23 = vadd.f32 %v1258_v36, %v3539_v52 }
 0x1d0   : > { %v1637_v19 = vrot.slane %v1584_v13, 1  ;;  %v1561_v11 = vadd.f32 %v1490_v10, %v1256_v60  ;;  %v1260_v47 = vpop.f32.mrf.mxu1 }
 0x1d1   : > { %v1492_v26 = vpop.f32.mrf.mxu0 }
 0x1d2   : > { %v1638_v30 = vsel %vm1625_vm8, %v1636_v18, %v1637_v19  ;;  %v1585_v43 = vmax.f32 %v1561_v11, 0.0  ;;  %v1263_v12 = vpop.f32.mrf.mxu1 }
 0x1d3   : > { %v1493_v5 = vpop.f32.mrf.mxu0  ;;  %v1682_v35 = vcombine.low %v3552_v28, %v1638_v30  ;;  %v1683_v34 = vcombine.high %v3552_v28, %v1638_v30  ;;  %v1264_v25 = vadd.f32 %v1263_v12, %v3543_v31 }
 0x1d4   : > { %v1639_v46 = vrot.slane %v1585_v43, 1  ;;  %v1562_v21 = vadd.f32 %v1493_v5, %v1259_v23  ;;  %v1265_v7 = vpop.f32.mrf.mxu1 }
 0x1d5   : > { %v1495_v6 = vpop.f32.mrf.mxu0  ;;  %v3589_v38 = vrot.slane %v1682_v35, %v3581_v41  ;;  %v3598_v36 = vrot.slane %v1683_v34, %v3581_v41 }
 0x1d6   : > { %v1640_v9 = vsel %vm1625_vm8, %v1637_v19, %v1639_v46  ;;  %v1586_v28 = vmax.f32 %v1562_v21, 0.0  ;;  %v1266_v53 = vpop.f32.mrf.mxu1 }
 0x1d7   : > { %v1498_v40 = vpop.f32.mrf.mxu0  ;;  %v1818_v55 = vcombine.low %v3556_v2, %v1640_v9  ;;  %v1819_v52 = vcombine.high %v3556_v2, %v1640_v9  ;;  %v1267_v61 = vadd.f32 %v1266_v53, %v3547_v14 }
 0x1d8   : > { %v1563_v3 = vadd.f32 %v1498_v40, %v1264_v25  ;;  %v1268_v45 = vpop.f32.mrf.mxu1  ;;  %v1641_v8 = vrot.slane %v1586_v28, 1 }
 0x1d9   : > { %v1500_v39 = vpop.f32.mrf.mxu0  ;;  %v3612_v46 = vrot.slane %v1818_v55, %v3581_v41  ;;  %v3615_v21 = vrot.slane %v1819_v52, %v3581_v41 }
 0x1da   : > { %v1587_v20 = vmax.f32 %v1563_v3, 0.0  ;;  %v1271_v2 = vpop.f32.mrf.mxu1 }
 0x1db   : > { %v1501_v0 = vpop.f32.mrf.mxu0 }
 0x1dc   : > { %v1642_v31 = vrot.slane %v1587_v20, 1  ;;  %v1564_v63 = vadd.f32 %v1501_v0, %v1267_v61  ;;  %v1273_v13 = vpop.f32.mrf.mxu1 }
 0x1dd   : > { %v1503_v51 = vpop.f32.mrf.mxu0 }
 0x1de   : > { %v1643_v32 = vsel %vm1625_vm8, %v1641_v8, %v1642_v31  ;;  %v1588_v42 = vmax.f32 %v1564_v63, 0.0  ;;  %v1274_v19 = vpop.f32.mrf.mxu1 }
 0x1df   : > { %v3583_v57 = vpop.f32.mrf.mxu0  ;;  %v1698_v56 = vcombine.low %v3561_v59, %v1643_v32  ;;  %v1699_v10 = vcombine.high %v3561_v59, %v1643_v32 }
 0x1e0   : > { %v1644_v60 = vrot.slane %v1588_v42, 1  ;;  %v1276_v43 = vpop.f32.mrf.mxu1 }
 0x1e1   : > { %v1508_v14 = vpop.f32.mrf.mxu0  ;;  %v3592_v26 = vrot.slane %v1698_v56, %v3581_v41  ;;  %v3595_v18 = vrot.slane %v1699_v10, %v3581_v41 }
 0x1e2   : > { %v1645_v5 = vsel %vm1625_vm8, %v1642_v31, %v1644_v60  ;;  %v1279_v4 = vpop.f32.mrf.mxu1 }
 0x1e3   : > { %v1509_v11 = vpop.f32.mrf.mxu0  ;;  %v1834_v59 = vcombine.low %v3565_v33, %v1645_v5  ;;  %v1835_v30 = vcombine.high %v3565_v33, %v1645_v5  ;;  %v1747_v35 = vcombine.high %v3589_v38, %v3592_v26  ;;  %v1746_v47 = vcombine.low %v3589_v38, %v3592_v26 }
 0x1e4   : > { %v1763_v6 = vcombine.high %v3598_v36, %v3595_v18  ;;  %v1762_v34 = vcombine.low %v3598_v36, %v3595_v18  ;;  %v1281_v12 = vpop.f32.mrf.mxu1  ;;  %v1275_v5 = vadd.f32 %v1274_v19, %v3511_v49 }
 0x1e5   : > { %v1511_v23 = vpop.f32.mrf.mxu0  ;;  %v3618_v33 = vrot.slane %v1834_v59, %v3581_v41  ;;  %v3621_v15 = vrot.slane %v1835_v30, %v3581_v41  ;;  %v1272_v30 = vadd.f32 %v1271_v2, %v3509_v48 }
 0x1e6   : > { %v1282_v7 = vpop.f32.mrf.mxu1 }
 0x1e7   : > { %v1514_v16 = vpop.f32.mrf.mxu0  ;;  %v1883_v9 = vcombine.high %v3612_v46, %v3618_v33  ;;  %v1882_v25 = vcombine.low %v3612_v46, %v3618_v33  ;;  %v1899_v55 = vcombine.high %v3615_v21, %v3621_v15  ;;  %v1898_v52 = vcombine.low %v3615_v21, %v3621_v15 }
 0x1e8   : > { %v1284_v28 = vpop.f32.mrf.mxu1  ;;  %v1565_v49 = vadd.f32 %v3583_v57, %v1272_v30 }
 0x1e9   : > { %v1516_v40 = vpop.f32.mrf.mxu0 }
 0x1ea   : > { %v1287_v50 = vpop.f32.mrf.mxu1 }
 0x1eb   : > { %v1517_v39 = vpop.f32.mrf.mxu0  ;;  %v1288_v43 = vadd.f32 %v1287_v50, %v3521_v1 }
 0x1ec   : > { %v1289_v0 = vpop.f32.mrf.mxu1 }
 0x1ed   : > { %v1519_v3 = vpop.f32.mrf.mxu0  ;;  %v1283_v0 = vadd.f32 %v1282_v7, %v3517_v37  ;;  %v2553_v37 = vmov 1934713408  }
 0x1ee   : > { %v1290_v61 = vpop.f32.mrf.mxu1  ;;  %v1280_v3 = vadd.f32 %v1279_v4, %v3513_v27  ;;  %v1749_v7 = vunpack.c.l.s4 %v2553_v37 }
 0x1ef   : > { %v1522_v53 = vpop.f32.mrf.mxu0  ;;  %v1291_v1 = vadd.f32 %v1290_v61, %v3525_v22 }
 0x1f0   : > { %v1292_v51 = vpop.f32.mrf.mxu1 }
 0x1f1   : > { %v1524_v20 = vpop.f32.mrf.mxu0  ;;  %v1566_v51 = vadd.f32 %v1509_v11, %v1275_v5  ;;  %v1750_v5 = vunpack.c.0.s8 %v1749_v7 }
 0x1f2   : > { %v1295_v31 = vpop.f32.mrf.mxu1 }
 0x1f3   : > { %v1525_v45 = vpop.f32.mrf.mxu0  ;;  %v1296_v59 = vadd.f32 %v1295_v31, %v3529_v54  ;;  %v1569_v54 = vadd.f32 %v1522_v53, %v1288_v43 }
 0x1f4   : > { %v1297_v32 = vpop.f32.mrf.mxu1 }
 0x1f5   : > { %v1527_v8 = vpop.f32.mrf.mxu0  ;;  %v1568_v32 = vadd.f32 %v1517_v39, %v1283_v0  ;;  %v1593_v57 = vmax.f32 %v1569_v54, 0.0 }
 0x1f6   : > { %v1298_v56 = vpop.f32.mrf.mxu1 }
 0x1f7   : > { %v1530_v63 = vpop.f32.mrf.mxu0  ;;  %v1299_v13 = vadd.f32 %v1298_v56, %v3533_v24  ;;  %v1589_v56 = vmax.f32 %v1565_v49, 0.0 }
 0x1f8   : > { %v1300_v14 = vpop.f32.mrf.mxu1  ;;  %v1571_v8 = vadd.f32 %v1530_v63, %v1296_v59 }
 0x1f9   : > { %v1532_v42 = vpop.f32.mrf.mxu0  ;;  %v1570_v14 = vadd.f32 %v1525_v45, %v1291_v1 }
 0x1fa   : > { %v1303_v23 = vpop.f32.mrf.mxu1  ;;  %v1590_v42 = vmax.f32 %v1566_v51, 0.0  ;;  %v1595_v11 = vmax.f32 %v1571_v8, 0.0 }
 0x1fb   : > { %v1533_v10 = vpop.f32.mrf.mxu0  ;;  %v1304_v28 = vadd.f32 %v1303_v23, %v3537_v58  ;;  %v1567_v58 = vadd.f32 %v1514_v16, %v1280_v3 }
 0x1fc   : > { %v1572_v40 = vadd.f32 %v1533_v10, %v1299_v13  ;;  %v1305_v24 = vpop.f32.mrf.mxu1  ;;  %v1647_v59 = vrot.slane %v1590_v42, 1  ;;  %v1656_v30 = vrot.slane %v1595_v11, 1 }
 0x1fd   : > { %v1535_v60 = vpop.f32.mrf.mxu0  ;;  %v1591_v61 = vmax.f32 %v1567_v58, 0.0  ;;  %v1594_v24 = vmax.f32 %v1570_v14, 0.0 }
 0x1fe   : > { %v1306_v48 = vpop.f32.mrf.mxu1  ;;  %v1596_v50 = vmax.f32 %v1572_v40, 0.0  ;;  %v1652_v40 = vrot.slane %v1593_v57, 1 }
 0x1ff   : > { %v1538_v12 = vpop.f32.mrf.mxu0  ;;  %v1307_v31 = vadd.f32 %v1306_v48, %v3541_v44  ;;  %v1592_v44 = vmax.f32 %v1568_v32, 0.0  ;;  %v1649_v51 = vrot.slane %v1591_v61, 1 }
 0x200   : > { %v1573_v19 = vadd.f32 %v1538_v12, %v1304_v28  ;;  %v1308_v27 = vpop.f32.mrf.mxu1  ;;  %v1657_v60 = vrot.slane %v1596_v50, 1  ;;  %v1646_v12 = vrot.slane %v1589_v56, 1 }
 0x201   : > { %v1540_v20 = vpop.f32.mrf.mxu0  ;;  %v1651_v8 = vrot.slane %v1592_v44, 1  ;;  %v1654_v27 = vrot.slane %v1594_v24, 1  ;;  %v1650_v7 = vsel %vm1625_vm8, %v1647_v59, %v1649_v51 }
 0x202   : > { %v1597_v53 = vmax.f32 %v1573_v19, 0.0  ;;  %v1311_v10 = vpop.f32.mrf.mxu1  ;;  %v1658_v45 = vsel %vm1625_vm8, %v1656_v30, %v1657_v60  ;;  %v1753_v19 = vsub.s32 %v1750_v5, %v3577_v62  ;;  %v1648_v48 = vsel %vm1625_vm8, %v1646_v12, %v1647_v59 }
 0x203   : > { %v1541_v2 = vpop.f32.mrf.mxu0  ;;  %v1312_v22 = vadd.f32 %v1311_v10, %v3545_v29  ;;  %v1714_v58 = vcombine.low %v1648_v48, %v1658_v45  ;;  %v1655_v38 = vsel %vm1625_vm8, %v1652_v40, %v1654_v27 }
 0x204   : > { %v1574_v63 = vadd.f32 %v1541_v2, %v1307_v31  ;;  %v1313_v16 = vpop.f32.mrf.mxu1  ;;  %v1659_v28 = vrot.slane %v1597_v53, 1  ;;  %v1653_v31 = vsel %vm1625_vm8, %v1651_v8, %v1652_v40  ;;  %v3654_v62 = vrot.slane %v1747_v35, %v1753_v19 }
 0x205   : > { %v1543_v4 = vpop.f32.mrf.mxu0  ;;  %v3659_v57 = vrot.slane %v1746_v47, %v1753_v19  ;;  %v3664_v53 = vrot.slane %v1763_v6, %v1753_v19  ;;  %v1722_v10 = vrot.slane %v1714_v58, %v3581_v41  ;;  %v3672_v35 = vrot.slane %v1762_v34, %v1753_v19 }
 0x206   : > { %v1598_v43 = vmax.f32 %v1574_v63, 0.0  ;;  %v1314_v3 = vpop.f32.mrf.mxu1  ;;  %v1660_v32 = vsel %vm1625_vm8, %v1657_v60, %v1659_v28  ;;  %v1715_v4 = vcombine.high %v1648_v48, %v1658_v45  ;;  %v3681_v18 = vrot.slane %v1883_v9, %v1753_v19 }
 0x207   : > { %v1546_v13 = vpop.f32.mrf.mxu0  ;;  %v1315_v29 = vadd.f32 %v1314_v3, %v3549_v17  ;;  %v1850_v63 = vcombine.low %v1650_v7, %v1660_v32  ;;  %v1851_v47 = vcombine.high %v1650_v7, %v1660_v32  ;;  %v1890_v40 = vrot.slane %v1882_v25, %v1753_v19 }
 0x208   : > { %v1575_v23 = vadd.f32 %v1546_v13, %v1312_v22  ;;  %v1316_v49 = vpop.f32.mrf.mxu1  ;;  %v1661_v2 = vrot.slane %v1598_v43, 1  ;;  %v1729_v26 = vrot.slane %v1715_v4, %v3581_v41  ;;  %v1913_v24 = vrot.slane %v1899_v55, %v1753_v19 }
 0x209   : > { %v1548_v39 = vpop.f32.mrf.mxu0  ;;  %v1858_v16 = vrot.slane %v1850_v63, %v3581_v41  ;;  %v1865_v43 = vrot.slane %v1851_v47, %v3581_v41 }
 0x20a   : > { %v1599_v20 = vmax.f32 %v1575_v23, 0.0 }
 0x20b   : > { %v1549_v0 = vpop.f32.mrf.mxu0 }
 0x20c   : > { %v1662_v1 = vrot.slane %v1599_v20, 1  ;;  %v1576_v50 = vadd.f32 %v1549_v0, %v1315_v29 }
 0x20d   : > { %v1551_v54 = vpop.f32.mrf.mxu0 }
 0x20e   : > { %v1663_v17 = vsel %vm1625_vm8, %v1661_v2, %v1662_v1  ;;  %v1600_v37 = vmax.f32 %v1576_v50, 0.0 }
 0x20f   : > { %v1730_v42 = vcombine.low %v1653_v31, %v1663_v17  ;;  %v1731_v11 = vcombine.high %v1653_v31, %v1663_v17 }
 0x210   : > { %v1664_v56 = vrot.slane %v1600_v37, 1 }
 0x211   : > { %v1738_v13 = vrot.slane %v1730_v42, %v3581_v41  ;;  %v1745_v14 = vrot.slane %v1731_v11, %v3581_v41 }
 0x212   : > { %v1665_v60 = vsel %vm1625_vm8, %v1662_v1, %v1664_v56 }
 0x213   : > { %v1866_v6 = vcombine.low %v1655_v38, %v1665_v60  ;;  %v1867_v22 = vcombine.high %v1655_v38, %v1665_v60  ;;  %v1779_v61 = vcombine.high %v1722_v10, %v1738_v13  ;;  %v1778_v44 = vcombine.low %v1722_v10, %v1738_v13 }
 0x214   : > { %v1795_v39 = vcombine.high %v1729_v26, %v1745_v14  ;;  %v1794_v5 = vcombine.low %v1729_v26, %v1745_v14 }
 0x215   : > { %v1874_v36 = vrot.slane %v1866_v6, %v3581_v41  ;;  %v1881_v34 = vrot.slane %v1867_v22, %v3581_v41  ;;  %v1793_v59 = vrot.slane %v1779_v61, %v1753_v19  ;;  %v1786_v30 = vrot.slane %v1778_v44, %v1753_v19 }
 0x216   : > { %v1809_v23 = vrot.slane %v1795_v39, %v1753_v19  ;;  %v1802_v12 = vrot.slane %v1794_v5, %v1753_v19  ;;  %v1906_v41 = vrot.slane %v1898_v52, %v1753_v19 }
 0x217   : > { %v1813_v28 = vcombine.high %v3654_v62, %v1793_v59  ;;  %v1811_v3 = vcombine.high %v3659_v57, %v1786_v30  ;;  %v1915_v9 = vcombine.high %v1858_v16, %v1874_v36  ;;  %v1914_v0 = vcombine.low %v1858_v16, %v1874_v36 }
 0x218   : > { %v1931_v45 = vcombine.high %v1865_v43, %v1881_v34  ;;  %v1930_v20 = vcombine.low %v1865_v43, %v1881_v34  ;;  %v1812_v25 = vcombine.low %v3654_v62, %v1793_v59  ;;  %v1810_v8 = vcombine.low %v3659_v57, %v1786_v30 }
 0x219   : > { %1959 = vrot.lane.b32.xlu0 %v1813_v28, %s2551_s10  ;;  %1955 = vrot.lane.b32.xlu1 %v1811_v3, %s2551_s10  ;;  %v1929_v46 = vrot.slane %v1915_v9, %v1753_v19  ;;  %v1922_v33 = vrot.slane %v1914_v0, %v1753_v19  ;;  %v1816_v55 = vcombine.low %v3664_v53, %v1809_v23 }
 0x21a   : > { %v1945_v29 = vrot.slane %v1931_v45, %v1753_v19  ;;  %v1938_v51 = vrot.slane %v1930_v20, %v1753_v19  ;;  %v1817_v49 = vcombine.high %v3664_v53, %v1809_v23  ;;  %v1815_v21 = vcombine.high %v3672_v35, %v1802_v12 }
 0x21b   : > { %v1814_v15 = vcombine.low %v3672_v35, %v1802_v12  ;;  %v1948_v52 = vcombine.low %v3681_v18, %v1929_v46  ;;  %v1946_v54 = vcombine.low %v1890_v40, %v1922_v33  ;;  %v1949_v2 = vcombine.high %v3681_v18, %v1929_v46 }
 0x21c   : > { %v1952_v48 = vcombine.low %v1913_v24, %v1945_v29  ;;  %v1950_v19 = vcombine.low %v1906_v41, %v1938_v51  ;;  %v1947_v1 = vcombine.high %v1890_v40, %v1922_v33  ;;  %v1953_v50 = vcombine.high %v1913_v24, %v1945_v29 }
 0x21d   : > { %1967 = vrot.lane.b32.xlu0 %v1817_v49, %s2551_s10  ;;  %1963 = vrot.lane.b32.xlu1 %v1815_v21, %s2551_s10  ;;  %v1951_v31 = vcombine.high %v1906_v41, %v1938_v51 }
 0x221   : > { %1975 = vrot.lane.b32.xlu0 %v1949_v2, %s2551_s10  ;;  %1971 = vrot.lane.b32.xlu1 %v1947_v1, %s2551_s10 }
 0x225   : > { %1983 = vrot.lane.b32.xlu0 %v1953_v50, %s2551_s10  ;;  %1979 = vrot.lane.b32.xlu1 %v1951_v31, %s2551_s10  ;;  %s2015_s10 = sadd.s32 %s2272_s21, %s2271_s11 }
 0x226   : > { %s2273_s27 = sshll.u32 %s2015_s10, 7 }
 0x227   : > { %s3725_s20 = scalar_lea.hbm %s3783_s3, %s2273_s27 }
 0x28b   : > { %v1960_v58 = vpop.permute.xlu0 %1959  ;;  %v1956_v32 = vpop.permute.xlu1 %1955 }
 0x28c   : > { %v1987_v27 = vsel %vm658_vm3, %v1812_v25, %v1960_v58  ;;  %v1986_v4 = vsel %vm658_vm3, %v1810_v8, %v1956_v32 }
 0x28d   : > { %1995 = vst [vmem:[%s235_s22 + $0x8] sm:$0xff] %v1987_v27  ;;  %1994 = vst [vmem:[%s235_s22] sm:$0xff] %v1986_v4 }
 0x28f   : > { %v1968_v17 = vpop.permute.xlu0 %1967  ;;  %v1964_v37 = vpop.permute.xlu1 %1963 }
 0x290   : > { %v1989_v7 = vsel %vm658_vm3, %v1816_v55, %v1968_v17  ;;  %v1988_v42 = vsel %vm658_vm3, %v1814_v15, %v1964_v37 }
 0x291   : > { %1997 = vst [vmem:[%s235_s22 + $0x18] sm:$0xff] %v1989_v7  ;;  %1996 = vst [vmem:[%s235_s22 + $0x10] sm:$0xff] %v1988_v42 }
 0x293   : > { %v1976_v11 = vpop.permute.xlu0 %1975  ;;  %v1972_v62 = vpop.permute.xlu1 %1971 }
 0x294   : > { %v1991_v63 = vsel %vm658_vm3, %v1948_v52, %v1976_v11  ;;  %v1990_v56 = vsel %vm658_vm3, %v1946_v54, %v1972_v62 }
 0x295   : > { %1999 = vst [vmem:[%s235_s22 + $0x28] sm:$0xff] %v1991_v63  ;;  %1998 = vst [vmem:[%s235_s22 + $0x20] sm:$0xff] %v1990_v56 }
 0x297   : > { %v1984_v57 = vpop.permute.xlu0 %1983  ;;  %v1980_v53 = vpop.permute.xlu1 %1979 }
 0x298   : > { %v1993_v10 = vsel %vm658_vm3, %v1952_v48, %v1984_v57  ;;  %v1992_v13 = vsel %vm658_vm3, %v1950_v19, %v1980_v53 }
 0x299   : > { %2001 = vst [vmem:[%s235_s22 + $0x38] sm:$0xff] %v1993_v10  ;;  %2000 = vst [vmem:[%s235_s22 + $0x30] sm:$0xff] %v1992_v13 }
 0x29a   : > { %2462 = shalt.err (!%p2459_p10)
}
 0x29b   : > { %s2463_s26 = scalar_lea.hbm %s3725_s20, 1024  ;;  %s2467_s23 = scalar_lea.hbm %s3783_s3, 4096 }
 0x29c   : > { %p2464_p11 = scmp.ne.s32.totalorder %s3725_s20, %s2463_s26  ;;  %p2468_p0 = scmp.lt.s32.totalorder %s3725_s20, %s3783_s3 }
 0x29d   : > { %p2469_p2 = scmp.lt.s32.totalorder %s2467_s23, %s2463_s26 }
 0x29e   : > { %p2465_p13 = pnand %p2464_p11, %p2640_p9 }
 0x29f   : > { %p2470_p8 = por %p2469_p2, %p2468_p0 }
 0x2a0   : > { %p2466_p1 = pneg %p2465_p13 }
 0x2a2   : > { %p2471_p4 = pnand %p2470_p8, %p2466_p1 }
 0x2a4   : > { %2474 = shalt.err (!%p2471_p4)
}
 0x2a5   : > { %2303 = dma.vmem_to_hbm [thread:$0]  (%p2640_p9), %s3727_s15, 1024, %s3725_s20, %s2003_s29  }
 0x2a6 PF: > { %p2314_p5 = scmp.ge.s32.totalorder %s2545_s19, 2  ;;  %s2031_s21 = sand.u32 1, %s2517_s12  }
 0x2a7   : > { %s2032_s10 = scalar_lea.sflag [#allocation4], %s2031_s21 }
 0x2a8   : > { %p2310_p3 = pnand %p2314_p5, %p2646_p12 }
 0x2aa   : > { %p2311_p6 = pneg %p2310_p3 }
 0x2ac   : > { %2512 = dma.done.wait (%p2311_p6), %s2032_s10, 1024  }
 0x2ad   : > { %2514 = vsyncadd (%p2311_p6), %s2032_s10, 4294966272  ;;  %s19_s19 = sadd.s32 1, %s2545_s19   ;;  %s3799_s28 = sld [smem:[#allocation8_spill]] }
 0x2ae   : > { %p16_p7 = scmp.ge.s32.totalorder %s19_s19, 6   ;;  %s3800_s27 = sld [smem:[#allocation9_spill]] }
 0x2af   : > { %s3801_s12 = smov %s2521_s13  ;;  %s3802_s13 = smov %s2525_s14 }
 0x2b0   : > { %s3803_s14 = smov %s2653_s6  ;;  %s3804_s15 = smov %s2537_s17 }
 0x2b1   : > { %s3805_s16 = smov %s2541_s18  ;;  %18 = sbr.rel (!%p16_p7) target bundleno = 7 (0x7), region = 83 }
 0x2b3   : > { %s3806_s17 = smov %s3799_s28 }
 0x2b4   : > { %s3807_s18 = smov %s3800_s27 }
 0x2b6   :  { %2037 = vsyncpa [#allocation3], 1 }
 0x2b7   :  { %2039 = vsyncpa [#allocation3 + $0x1], 1 }
 0x2b8   :  { %2040 = vsyncpa [#allocation4], 1 }
 0x2b9   :  { %2042 = vsyncpa [#allocation4 + $0x1], 1 }

</bundles_post_ra>
